<compile_context>
chip_gen: v7x
topology: tpu7x:2x2x1
jax: 0.10.0
libtpu: 0.0.40
codegen_flags: <defaults>
</compile_context>

<pallas_src>
import math
import functools

import jax
import jax.numpy as jnp
from jax import lax
from jax.experimental import pallas as pl
from jax.experimental.pallas import tpu as pltpu


# ----------------------------------------------------------------------------
# Pallas kernel: full forward pass (bi-LSTM x 2 layers + classifier MLP).
# ----------------------------------------------------------------------------
def _bilstm_classifier_kernel(
    xc_ref,          # (T*BP, 2D) f32   [x_t | x_{T-1-t}], time-major, padded batch
    w0c_ref,         # (2D, 8H)  f32    interleaved cols [i_f i_b f_f f_b g_f g_b o_f o_b]
    b0c_ref,         # (1, 8H)   f32    interleaved bias
    whh0_ref,        # (2H, 8H)  bf16   block-diag: h_f rows -> fwd cols, h_b rows -> bwd cols
    wih1f_ref,       # (2H, 4H)  f32
    b1f_ref,         # (1, 4H)   f32
    wih1b_ref,       # (2H, 4H)  f32
    b1b_ref,         # (1, 4H)   f32
    whh1f_ref,       # (H, 4H)   bf16
    wc1_ref, bc1_ref,  # (2H,256) (1,256)
    wc2_ref, bc2_ref,  # (256,128) (1,128)
    wc3_ref, bc3_ref,  # (128,64)  (1,64)
    wc4_ref, bc4_ref,  # (1,64)    (1,1)
    out_ref,         # (BP, 1)
    *, T, BP,
):
    H = whh1f_ref.shape[0]
    f32 = jnp.float32
    bf16 = jnp.bfloat16

    # ---- Hoisted layer-0 input projection: one matmul, all timesteps, both
    # directions (backward time reversal is baked into xc's second half). -----
    gin0 = (jnp.dot(xc_ref[...], w0c_ref[...], preferred_element_type=f32)
            + b0c_ref[...])                                  # (T*BP, 8H)

    # ---- Fused layer-0 fwd+bwd recurrence (fully unrolled, lane-fused state) -
    # h / c are (BP, 2H) = [fwd | bwd]; one bf16 recurrent matmul per step.
    whh0 = whh0_ref[...]
    h = jnp.zeros((BP, 2 * H), f32)
    c = jnp.zeros((BP, 2 * H), f32)
    hs = []
    for s in range(T):
        rec = jnp.dot(h.astype(bf16), whh0, preferred_element_type=f32)  # (BP, 8H)
        gates = gin0[s * BP:(s + 1) * BP, :] + rec           # tile-aligned slice
        sg = jax.nn.sigmoid(gates)
        th = jnp.tanh(gates)
        i_g = sg[:, 0 * H:2 * H]
        f_g = sg[:, 2 * H:4 * H]
        g_g = th[:, 4 * H:6 * H]
        o_g = sg[:, 6 * H:8 * H]
        c = f_g * c + i_g * g_g
        h = o_g * jnp.tanh(c)
        hs.append(h)        # [h_f(time s) | h_b(time T-1-s)], kept as values

    # ---- Assemble layer-0 outputs in time order (one-shot, off serial chain) -
    hf = jnp.concatenate([hs[t][:, 0:H] for t in range(T)], axis=0)            # (T*BP, H)
    hb = jnp.concatenate([hs[T - 1 - t][:, H:2 * H] for t in range(T)], axis=0)  # (T*BP, H)

    # ---- Hoisted layer-1 forward input projection ----------------------------
    gin1f = (jnp.dot(hf, wih1f_ref[0:H, :], preferred_element_type=f32)
             + jnp.dot(hb, wih1f_ref[H:2 * H, :], preferred_element_type=f32)
             + b1f_ref[...])                                 # (T*BP, 4H)

    # ---- Layer-1 forward recurrence (only the final hidden state is needed) --
    whh1 = whh1f_ref[...]
    h1 = jnp.zeros((BP, H), f32)
    c1 = jnp.zeros((BP, H), f32)
    for t in range(T):
        gates = (gin1f[t * BP:(t + 1) * BP, :]
                 + jnp.dot(h1.astype(bf16), whh1, preferred_element_type=f32))
        sg = jax.nn.sigmoid(gates)
        th = jnp.tanh(gates)
        c1 = sg[:, H:2 * H] * c1 + sg[:, 0:H] * th[:, 2 * H:3 * H]
        h1 = sg[:, 3 * H:4 * H] * jnp.tanh(c1)

    # ---- Layer-1 backward output at t = T-1: first step of the reverse scan
    # (zero initial state => recurrent term vanishes). -------------------------
    gates_b = (jnp.dot(hs[T - 1][:, 0:H], wih1b_ref[0:H, :], preferred_element_type=f32)
               + jnp.dot(hs[0][:, H:2 * H], wih1b_ref[H:2 * H, :], preferred_element_type=f32)
               + b1b_ref[...])
    sg = jax.nn.sigmoid(gates_b)
    th = jnp.tanh(gates_b)
    c1b = sg[:, 0:H] * th[:, 2 * H:3 * H]
    h1b = sg[:, 3 * H:4 * H] * jnp.tanh(c1b)

    # ---- Classifier MLP (Dropout == identity at inference) -------------------
    z = (jnp.dot(h1, wc1_ref[0:H, :], preferred_element_type=f32)
         + jnp.dot(h1b, wc1_ref[H:2 * H, :], preferred_element_type=f32)
         + bc1_ref[...])
    z = jnp.maximum(z, 0.0)
    z = jnp.dot(z, wc2_ref[...], preferred_element_type=f32) + bc2_ref[...]
    z = jnp.maximum(z, 0.0)
    z = jnp.dot(z, wc3_ref[...], preferred_element_type=f32) + bc3_ref[...]
    z = jnp.maximum(z, 0.0)
    # Final layer has width 1 -> broadcast-mul + lane reduce.
    logit = jnp.sum(z * wc4_ref[...], axis=-1, keepdims=True) + bc4_ref[...]
    out_ref[...] = jax.nn.sigmoid(logit)


# ----------------------------------------------------------------------------
# Per-call wrapper (only data prep + pallas_call; weight fusion is pre-done).
# ----------------------------------------------------------------------------
@jax.jit
def bilstm_classifier(x, packed):
    """x: (B, T, D) float32 -> (B, 1) float32 (sigmoid probabilities)."""
    B, T, D = x.shape
    H = packed["whh1f"].shape[0]
    BP = ((B + 7) // 8) * 8            # pad batch rows to a full sublane tile

    x_tm = jnp.transpose(x, (1, 0, 2))                          # (T, B, D)
    x_tm = jnp.pad(x_tm, ((0, 0), (0, BP - B), (0, 0)))         # (T, BP, D)
    x_comb = jnp.concatenate([x_tm, x_tm[::-1]], axis=-1)       # (T, BP, 2D)
    x_comb = x_comb.reshape(T * BP, 2 * D)

    args = [
        x_comb,
        packed["w0c"], packed["b0c"], packed["whh0bd"],
        packed["wih1f"], packed["b1f"], packed["wih1b"], packed["b1b"],
        packed["whh1f"],
        packed["wc1"], packed["bc1"], packed["wc2"], packed["bc2"],
        packed["wc3"], packed["bc3"], packed["wc4"], packed["bc4"],
    ]

    vmem = pl.BlockSpec(memory_space=pltpu.MemorySpace.VMEM)
    kernel = functools.partial(_bilstm_classifier_kernel, T=T, BP=BP)
    out = pl.pallas_call(
        kernel,
        out_shape=jax.ShapeDtypeStruct((BP, 1), jnp.float32),
        in_specs=[vmem] * len(args),
        out_specs=vmem,
    )(*args)
    return out[:B]


# ----------------------------------------------------------------------------
# One-time parameter packing (hoisted out of the per-call path).
# ----------------------------------------------------------------------------
def _interleave_gate_cols(wf, wb, H):
    """[i|f|g|o] per-direction columns -> [i_f|i_b|f_f|f_b|g_f|g_b|o_f|o_b]."""
    parts = []
    for g in range(4):
        parts.append(wf[:, g * H:(g + 1) * H])
        parts.append(wb[:, g * H:(g + 1) * H])
    return jnp.concatenate(parts, axis=1)


def pack_params(p):
    H = p["whh1f"].shape[0]
    D = p["wih0f"].shape[0]
    zD = jnp.zeros((D, 4 * H), jnp.float32)
    zH = jnp.zeros((H, 4 * H), jnp.float32)

    # Layer-0 input projection: rows 0:D act on x_t (fwd cols), rows D:2D on
    # x_{T-1-t} (bwd cols); gate columns interleaved.
    w0c = jnp.concatenate(
        [_interleave_gate_cols(p["wih0f"], zD, H),
         _interleave_gate_cols(zD, p["wih0b"], H)], axis=0)          # (2D, 8H)
    b0c = _interleave_gate_cols(p["b0f"], p["b0b"], H)               # (1, 8H)

    # Layer-0 recurrence: block-diagonal over directions, interleaved columns.
    whh0bd = jnp.concatenate(
        [_interleave_gate_cols(p["whh0f"], zH, H),
         _interleave_gate_cols(zH, p["whh0b"], H)], axis=0).astype(jnp.bfloat16)

    return {
        "w0c": w0c, "b0c": b0c, "whh0bd": whh0bd,
        "wih1f": p["wih1f"], "b1f": p["b1f"],
        "wih1b": p["wih1b"], "b1b": p["b1b"],
        "whh1f": p["whh1f"].astype(jnp.bfloat16),
        "wc1": p["wc1"], "bc1": p["bc1"],
        "wc2": p["wc2"], "bc2": p["bc2"],
        "wc3": p["wc3"], "bc3": p["bc3"],
        "wc4": p["wc4"].reshape(1, -1), "bc4": p["bc4"],
    }


# ----------------------------------------------------------------------------
# Deterministic parameter initialization (shapes mirror the PyTorch module,
# stored pre-transposed for right-multiplication).
# ----------------------------------------------------------------------------
def init_params(key, input_size, hidden_size):
    H = hidden_size
    keys = iter(jax.random.split(key, 24))

    def u(shape, fan_in):
        bound = 1.0 / math.sqrt(fan_in)
        return jax.random.uniform(next(keys), shape, jnp.float32, -bound, bound)

    p = {}
    # LSTM layer 0 (input = input_size), forward / backward.  bias = b_ih + b_hh.
    p["wih0f"] = u((input_size, 4 * H), H)
    p["whh0f"] = u((H, 4 * H), H)
    p["b0f"] = u((1, 4 * H), H) + u((1, 4 * H), H)
    p["wih0b"] = u((input_size, 4 * H), H)
    p["whh0b"] = u((H, 4 * H), H)
    p["b0b"] = u((1, 4 * H), H) + u((1, 4 * H), H)
    # LSTM layer 1 (input = 2H), forward / backward.
    p["wih1f"] = u((2 * H, 4 * H), H)
    p["whh1f"] = u((H, 4 * H), H)
    p["b1f"] = u((1, 4 * H), H) + u((1, 4 * H), H)
    p["wih1b"] = u((2 * H, 4 * H), H)
    p["whh1b"] = u((H, 4 * H), H)
    p["b1b"] = u((1, 4 * H), H) + u((1, 4 * H), H)
    # Classifier: Linear(2H,256) -> Linear(256,128) -> Linear(128,64) -> Linear(64,1)
    p["wc1"] = u((2 * H, 256), 2 * H)
    p["bc1"] = u((1, 256), 2 * H)
    p["wc2"] = u((256, 128), 256)
    p["bc2"] = u((1, 128), 256)
    p["wc3"] = u((128, 64), 128)
    p["bc3"] = u((1, 64), 128)
    p["wc4"] = u((64, 1), 64)
    p["bc4"] = u((1, 1), 64)
    return p


# ----------------------------------------------------------------------------
# Pure-JAX reference (eval-mode semantics of the PyTorch module).
# ----------------------------------------------------------------------------
def _lstm_dir_ref(x, wih, whh, b, reverse):
    B, T, _ = x.shape
    H = whh.shape[0]

    def step(carry, x_t):
        h, c = carry
        gates = x_t @ wih + h @ whh + b
        i = jax.nn.sigmoid(gates[:, 0 * H:1 * H])
        f = jax.nn.sigmoid(gates[:, 1 * H:2 * H])
        g = jnp.tanh(gates[:, 2 * H:3 * H])
        o = jax.nn.sigmoid(gates[:, 3 * H:4 * H])
        c = f * c + i * g
        h = o * jnp.tanh(c)
        return (h, c), h

    xs = jnp.transpose(x, (1, 0, 2))
    if reverse:
        xs = xs[::-1]
    init = (jnp.zeros((B, H), jnp.float32), jnp.zeros((B, H), jnp.float32))
    _, hs = lax.scan(step, init, xs)
    if reverse:
        hs = hs[::-1]
    return jnp.transpose(hs, (1, 0, 2))


def reference(x, p):
    h0f = _lstm_dir_ref(x, p["wih0f"], p["whh0f"], p["b0f"], False)
    h0b = _lstm_dir_ref(x, p["wih0b"], p["whh0b"], p["b0b"], True)
    l0 = jnp.concatenate([h0f, h0b], axis=-1)
    h1f = _lstm_dir_ref(l0, p["wih1f"], p["whh1f"], p["b1f"], False)
    h1b = _lstm_dir_ref(l0, p["wih1b"], p["whh1b"], p["b1b"], True)
    last = jnp.concatenate([h1f[:, -1, :], h1b[:, -1, :]], axis=-1)
    z = jnp.maximum(last @ p["wc1"] + p["bc1"], 0.0)
    z = jnp.maximum(z @ p["wc2"] + p["bc2"], 0.0)
    z = jnp.maximum(z @ p["wc3"] + p["bc3"], 0.0)
    return jax.nn.sigmoid(z @ p["wc4"] + p["bc4"])


if __name__ == "__main__":
    # Small shapes consistent with the module: (batch, seq, features), hidden.
    B, T, D, H = 2, 8, 64, 32

    key = jax.random.PRNGKey(0)
    kx, kp = jax.random.split(key)
    x = jax.random.normal(kx, (B, T, D), jnp.float32)
    params = init_params(kp, input_size=D, hidden_size=H)

    # One-time layout fusion (off the per-call path).
    packed = pack_params(params)
    packed = jax.tree_util.tree_map(jax.block_until_ready, packed)

    out = bilstm_classifier(x, packed)
    out = jax.block_until_ready(out)

    ref = reference(x, params)
    assert out.shape == (B, 1), out.shape
    assert jnp.all(jnp.isfinite(out))
    assert jnp.allclose(out, ref, atol=1e-2, rtol=1e-2), (out, ref)

    print("KERNEL_OK")
</pallas_src>

<mosaic_0001>
module attributes {stable_mosaic.version = 11 : i64} {
  func.func @_bilstm_classifier_kernel(%arg0: memref<64x128xf32, #tpu.memory_space<vmem>>, %arg1: memref<128x256xf32, #tpu.memory_space<vmem>>, %arg2: memref<1x256xf32, #tpu.memory_space<vmem>>, %arg3: memref<64x256xbf16, #tpu.memory_space<vmem>>, %arg4: memref<64x128xf32, #tpu.memory_space<vmem>>, %arg5: memref<1x128xf32, #tpu.memory_space<vmem>>, %arg6: memref<64x128xf32, #tpu.memory_space<vmem>>, %arg7: memref<1x128xf32, #tpu.memory_space<vmem>>, %arg8: memref<32x128xbf16, #tpu.memory_space<vmem>>, %arg9: memref<64x256xf32, #tpu.memory_space<vmem>>, %arg10: memref<1x256xf32, #tpu.memory_space<vmem>>, %arg11: memref<256x128xf32, #tpu.memory_space<vmem>>, %arg12: memref<1x128xf32, #tpu.memory_space<vmem>>, %arg13: memref<128x64xf32, #tpu.memory_space<vmem>>, %arg14: memref<1x64xf32, #tpu.memory_space<vmem>>, %arg15: memref<1x64xf32, #tpu.memory_space<vmem>>, %arg16: memref<1x1xf32, #tpu.memory_space<vmem>>, %arg17: memref<8x1xf32, #tpu.memory_space<vmem>>) attributes {dimension_semantics = [], scalar_prefetch = 0 : i64, scratch_operands = 0 : i64, tpu.core_type = #tpu.core_type<tc>} {
    %c0 = arith.constant 0 : index
    %c0_0 = arith.constant 0 : index
    %0 = vector.load %arg0[%c0, %c0_0] : memref<64x128xf32, #tpu.memory_space<vmem>>, vector<64x128xf32>
    %c0_1 = arith.constant 0 : index
    %c0_2 = arith.constant 0 : index
    %1 = vector.load %arg1[%c0_1, %c0_2] : memref<128x256xf32, #tpu.memory_space<vmem>>, vector<128x256xf32>
    %cst = arith.constant dense<0.000000e+00> : vector<64x256xf32>
    %2 = tpu.matmul %0, %1, %cst {dimension_numbers = #tpu.dot_dimension_numbers<[1], [0], [0], [1], [0, 0, 1, 1], [], []>} : vector<64x128xf32>, vector<128x256xf32>, vector<64x256xf32> -> vector<64x256xf32>
    %c0_3 = arith.constant 0 : index
    %c0_4 = arith.constant 0 : index
    %3 = vector.load %arg2[%c0_3, %c0_4] : memref<1x256xf32, #tpu.memory_space<vmem>>, vector<1x256xf32>
    %4 = vector.broadcast %3 : vector<1x256xf32> to vector<64x256xf32>
    %5 = arith.addf %2, %4 : vector<64x256xf32>
    %c0_5 = arith.constant 0 : index
    %c0_6 = arith.constant 0 : index
    %6 = vector.load %arg3[%c0_5, %c0_6] : memref<64x256xbf16, #tpu.memory_space<vmem>>, vector<64x256xbf16>
    %cst_7 = arith.constant 0.000000e+00 : f32
    %7 = vector.broadcast %cst_7 : f32 to vector<8x64xf32>
    %cst_8 = arith.constant 0.000000e+00 : f32
    %8 = vector.broadcast %cst_8 : f32 to vector<8x64xf32>
    %9 = arith.truncf %7 : vector<8x64xf32> to vector<8x64xbf16>
    %cst_9 = arith.constant dense<0.000000e+00> : vector<8x256xf32>
    %10 = tpu.matmul %9, %6, %cst_9 {dimension_numbers = #tpu.dot_dimension_numbers<[1], [0], [0], [1], [0, 0, 1, 1], [], []>} : vector<8x64xbf16>, vector<64x256xbf16>, vector<8x256xf32> -> vector<8x256xf32>
    %11 = vector.extract_strided_slice %5 {offsets = [0, 0], sizes = [8, 256], strides = [1, 1]} : vector<64x256xf32> to vector<8x256xf32>
    %12 = arith.addf %11, %10 : vector<8x256xf32>
    %13 = arith.negf %12 : vector<8x256xf32>
    %14 = math.exp %13 : vector<8x256xf32>
    %cst_10 = arith.constant 1.000000e+00 : f32
    %15 = vector.broadcast %cst_10 : f32 to vector<8x256xf32>
    %16 = arith.addf %15, %14 : vector<8x256xf32>
    %17 = arith.divf %15, %16 : vector<8x256xf32>
    %18 = math.tanh %12 : vector<8x256xf32>
    %19 = vector.extract_strided_slice %17 {offsets = [0, 0], sizes = [8, 64], strides = [1, 1]} : vector<8x256xf32> to vector<8x64xf32>
    %20 = vector.extract_strided_slice %17 {offsets = [0, 64], sizes = [8, 64], strides = [1, 1]} : vector<8x256xf32> to vector<8x64xf32>
    %21 = vector.extract_strided_slice %18 {offsets = [0, 128], sizes = [8, 64], strides = [1, 1]} : vector<8x256xf32> to vector<8x64xf32>
    %22 = vector.extract_strided_slice %17 {offsets = [0, 192], sizes = [8, 64], strides = [1, 1]} : vector<8x256xf32> to vector<8x64xf32>
    %23 = arith.mulf %20, %8 : vector<8x64xf32>
    %24 = arith.mulf %19, %21 : vector<8x64xf32>
    %25 = arith.addf %23, %24 : vector<8x64xf32>
    %26 = math.tanh %25 : vector<8x64xf32>
    %27 = arith.mulf %22, %26 : vector<8x64xf32>
    %28 = arith.truncf %27 : vector<8x64xf32> to vector<8x64xbf16>
    %cst_11 = arith.constant dense<0.000000e+00> : vector<8x256xf32>
    %29 = tpu.matmul %28, %6, %cst_11 {dimension_numbers = #tpu.dot_dimension_numbers<[1], [0], [0], [1], [0, 0, 1, 1], [], []>} : vector<8x64xbf16>, vector<64x256xbf16>, vector<8x256xf32> -> vector<8x256xf32>
    %30 = vector.extract_strided_slice %5 {offsets = [8, 0], sizes = [8, 256], strides = [1, 1]} : vector<64x256xf32> to vector<8x256xf32>
    %31 = arith.addf %30, %29 : vector<8x256xf32>
    %32 = arith.negf %31 : vector<8x256xf32>
    %33 = math.exp %32 : vector<8x256xf32>
    %cst_12 = arith.constant 1.000000e+00 : f32
    %34 = vector.broadcast %cst_12 : f32 to vector<8x256xf32>
    %35 = arith.addf %34, %33 : vector<8x256xf32>
    %36 = arith.divf %34, %35 : vector<8x256xf32>
    %37 = math.tanh %31 : vector<8x256xf32>
    %38 = vector.extract_strided_slice %36 {offsets = [0, 0], sizes = [8, 64], strides = [1, 1]} : vector<8x256xf32> to vector<8x64xf32>
    %39 = vector.extract_strided_slice %36 {offsets = [0, 64], sizes = [8, 64], strides = [1, 1]} : vector<8x256xf32> to vector<8x64xf32>
    %40 = vector.extract_strided_slice %37 {offsets = [0, 128], sizes = [8, 64], strides = [1, 1]} : vector<8x256xf32> to vector<8x64xf32>
    %41 = vector.extract_strided_slice %36 {offsets = [0, 192], sizes = [8, 64], strides = [1, 1]} : vector<8x256xf32> to vector<8x64xf32>
    %42 = arith.mulf %39, %25 : vector<8x64xf32>
    %43 = arith.mulf %38, %40 : vector<8x64xf32>
    %44 = arith.addf %42, %43 : vector<8x64xf32>
    %45 = math.tanh %44 : vector<8x64xf32>
    %46 = arith.mulf %41, %45 : vector<8x64xf32>
    %47 = arith.truncf %46 : vector<8x64xf32> to vector<8x64xbf16>
    %cst_13 = arith.constant dense<0.000000e+00> : vector<8x256xf32>
    %48 = tpu.matmul %47, %6, %cst_13 {dimension_numbers = #tpu.dot_dimension_numbers<[1], [0], [0], [1], [0, 0, 1, 1], [], []>} : vector<8x64xbf16>, vector<64x256xbf16>, vector<8x256xf32> -> vector<8x256xf32>
    %49 = vector.extract_strided_slice %5 {offsets = [16, 0], sizes = [8, 256], strides = [1, 1]} : vector<64x256xf32> to vector<8x256xf32>
    %50 = arith.addf %49, %48 : vector<8x256xf32>
    %51 = arith.negf %50 : vector<8x256xf32>
    %52 = math.exp %51 : vector<8x256xf32>
    %cst_14 = arith.constant 1.000000e+00 : f32
    %53 = vector.broadcast %cst_14 : f32 to vector<8x256xf32>
    %54 = arith.addf %53, %52 : vector<8x256xf32>
    %55 = arith.divf %53, %54 : vector<8x256xf32>
    %56 = math.tanh %50 : vector<8x256xf32>
    %57 = vector.extract_strided_slice %55 {offsets = [0, 0], sizes = [8, 64], strides = [1, 1]} : vector<8x256xf32> to vector<8x64xf32>
    %58 = vector.extract_strided_slice %55 {offsets = [0, 64], sizes = [8, 64], strides = [1, 1]} : vector<8x256xf32> to vector<8x64xf32>
    %59 = vector.extract_strided_slice %56 {offsets = [0, 128], sizes = [8, 64], strides = [1, 1]} : vector<8x256xf32> to vector<8x64xf32>
    %60 = vector.extract_strided_slice %55 {offsets = [0, 192], sizes = [8, 64], strides = [1, 1]} : vector<8x256xf32> to vector<8x64xf32>
    %61 = arith.mulf %58, %44 : vector<8x64xf32>
    %62 = arith.mulf %57, %59 : vector<8x64xf32>
    %63 = arith.addf %61, %62 : vector<8x64xf32>
    %64 = math.tanh %63 : vector<8x64xf32>
    %65 = arith.mulf %60, %64 : vector<8x64xf32>
    %66 = arith.truncf %65 : vector<8x64xf32> to vector<8x64xbf16>
    %cst_15 = arith.constant dense<0.000000e+00> : vector<8x256xf32>
    %67 = tpu.matmul %66, %6, %cst_15 {dimension_numbers = #tpu.dot_dimension_numbers<[1], [0], [0], [1], [0, 0, 1, 1], [], []>} : vector<8x64xbf16>, vector<64x256xbf16>, vector<8x256xf32> -> vector<8x256xf32>
    %68 = vector.extract_strided_slice %5 {offsets = [24, 0], sizes = [8, 256], strides = [1, 1]} : vector<64x256xf32> to vector<8x256xf32>
    %69 = arith.addf %68, %67 : vector<8x256xf32>
    %70 = arith.negf %69 : vector<8x256xf32>
    %71 = math.exp %70 : vector<8x256xf32>
    %cst_16 = arith.constant 1.000000e+00 : f32
    %72 = vector.broadcast %cst_16 : f32 to vector<8x256xf32>
    %73 = arith.addf %72, %71 : vector<8x256xf32>
    %74 = arith.divf %72, %73 : vector<8x256xf32>
    %75 = math.tanh %69 : vector<8x256xf32>
    %76 = vector.extract_strided_slice %74 {offsets = [0, 0], sizes = [8, 64], strides = [1, 1]} : vector<8x256xf32> to vector<8x64xf32>
    %77 = vector.extract_strided_slice %74 {offsets = [0, 64], sizes = [8, 64], strides = [1, 1]} : vector<8x256xf32> to vector<8x64xf32>
    %78 = vector.extract_strided_slice %75 {offsets = [0, 128], sizes = [8, 64], strides = [1, 1]} : vector<8x256xf32> to vector<8x64xf32>
    %79 = vector.extract_strided_slice %74 {offsets = [0, 192], sizes = [8, 64], strides = [1, 1]} : vector<8x256xf32> to vector<8x64xf32>
    %80 = arith.mulf %77, %63 : vector<8x64xf32>
    %81 = arith.mulf %76, %78 : vector<8x64xf32>
    %82 = arith.addf %80, %81 : vector<8x64xf32>
    %83 = math.tanh %82 : vector<8x64xf32>
    %84 = arith.mulf %79, %83 : vector<8x64xf32>
    %85 = arith.truncf %84 : vector<8x64xf32> to vector<8x64xbf16>
    %cst_17 = arith.constant dense<0.000000e+00> : vector<8x256xf32>
    %86 = tpu.matmul %85, %6, %cst_17 {dimension_numbers = #tpu.dot_dimension_numbers<[1], [0], [0], [1], [0, 0, 1, 1], [], []>} : vector<8x64xbf16>, vector<64x256xbf16>, vector<8x256xf32> -> vector<8x256xf32>
    %87 = vector.extract_strided_slice %5 {offsets = [32, 0], sizes = [8, 256], strides = [1, 1]} : vector<64x256xf32> to vector<8x256xf32>
    %88 = arith.addf %87, %86 : vector<8x256xf32>
    %89 = arith.negf %88 : vector<8x256xf32>
    %90 = math.exp %89 : vector<8x256xf32>
    %cst_18 = arith.constant 1.000000e+00 : f32
    %91 = vector.broadcast %cst_18 : f32 to vector<8x256xf32>
    %92 = arith.addf %91, %90 : vector<8x256xf32>
    %93 = arith.divf %91, %92 : vector<8x256xf32>
    %94 = math.tanh %88 : vector<8x256xf32>
    %95 = vector.extract_strided_slice %93 {offsets = [0, 0], sizes = [8, 64], strides = [1, 1]} : vector<8x256xf32> to vector<8x64xf32>
    %96 = vector.extract_strided_slice %93 {offsets = [0, 64], sizes = [8, 64], strides = [1, 1]} : vector<8x256xf32> to vector<8x64xf32>
    %97 = vector.extract_strided_slice %94 {offsets = [0, 128], sizes = [8, 64], strides = [1, 1]} : vector<8x256xf32> to vector<8x64xf32>
    %98 = vector.extract_strided_slice %93 {offsets = [0, 192], sizes = [8, 64], strides = [1, 1]} : vector<8x256xf32> to vector<8x64xf32>
    %99 = arith.mulf %96, %82 : vector<8x64xf32>
    %100 = arith.mulf %95, %97 : vector<8x64xf32>
    %101 = arith.addf %99, %100 : vector<8x64xf32>
    %102 = math.tanh %101 : vector<8x64xf32>
    %103 = arith.mulf %98, %102 : vector<8x64xf32>
    %104 = arith.truncf %103 : vector<8x64xf32> to vector<8x64xbf16>
    %cst_19 = arith.constant dense<0.000000e+00> : vector<8x256xf32>
    %105 = tpu.matmul %104, %6, %cst_19 {dimension_numbers = #tpu.dot_dimension_numbers<[1], [0], [0], [1], [0, 0, 1, 1], [], []>} : vector<8x64xbf16>, vector<64x256xbf16>, vector<8x256xf32> -> vector<8x256xf32>
    %106 = vector.extract_strided_slice %5 {offsets = [40, 0], sizes = [8, 256], strides = [1, 1]} : vector<64x256xf32> to vector<8x256xf32>
    %107 = arith.addf %106, %105 : vector<8x256xf32>
    %108 = arith.negf %107 : vector<8x256xf32>
    %109 = math.exp %108 : vector<8x256xf32>
    %cst_20 = arith.constant 1.000000e+00 : f32
    %110 = vector.broadcast %cst_20 : f32 to vector<8x256xf32>
    %111 = arith.addf %110, %109 : vector<8x256xf32>
    %112 = arith.divf %110, %111 : vector<8x256xf32>
    %113 = math.tanh %107 : vector<8x256xf32>
    %114 = vector.extract_strided_slice %112 {offsets = [0, 0], sizes = [8, 64], strides = [1, 1]} : vector<8x256xf32> to vector<8x64xf32>
    %115 = vector.extract_strided_slice %112 {offsets = [0, 64], sizes = [8, 64], strides = [1, 1]} : vector<8x256xf32> to vector<8x64xf32>
    %116 = vector.extract_strided_slice %113 {offsets = [0, 128], sizes = [8, 64], strides = [1, 1]} : vector<8x256xf32> to vector<8x64xf32>
    %117 = vector.extract_strided_slice %112 {offsets = [0, 192], sizes = [8, 64], strides = [1, 1]} : vector<8x256xf32> to vector<8x64xf32>
    %118 = arith.mulf %115, %101 : vector<8x64xf32>
    %119 = arith.mulf %114, %116 : vector<8x64xf32>
    %120 = arith.addf %118, %119 : vector<8x64xf32>
    %121 = math.tanh %120 : vector<8x64xf32>
    %122 = arith.mulf %117, %121 : vector<8x64xf32>
    %123 = arith.truncf %122 : vector<8x64xf32> to vector<8x64xbf16>
    %cst_21 = arith.constant dense<0.000000e+00> : vector<8x256xf32>
    %124 = tpu.matmul %123, %6, %cst_21 {dimension_numbers = #tpu.dot_dimension_numbers<[1], [0], [0], [1], [0, 0, 1, 1], [], []>} : vector<8x64xbf16>, vector<64x256xbf16>, vector<8x256xf32> -> vector<8x256xf32>
    %125 = vector.extract_strided_slice %5 {offsets = [48, 0], sizes = [8, 256], strides = [1, 1]} : vector<64x256xf32> to vector<8x256xf32>
    %126 = arith.addf %125, %124 : vector<8x256xf32>
    %127 = arith.negf %126 : vector<8x256xf32>
    %128 = math.exp %127 : vector<8x256xf32>
    %cst_22 = arith.constant 1.000000e+00 : f32
    %129 = vector.broadcast %cst_22 : f32 to vector<8x256xf32>
    %130 = arith.addf %129, %128 : vector<8x256xf32>
    %131 = arith.divf %129, %130 : vector<8x256xf32>
    %132 = math.tanh %126 : vector<8x256xf32>
    %133 = vector.extract_strided_slice %131 {offsets = [0, 0], sizes = [8, 64], strides = [1, 1]} : vector<8x256xf32> to vector<8x64xf32>
    %134 = vector.extract_strided_slice %131 {offsets = [0, 64], sizes = [8, 64], strides = [1, 1]} : vector<8x256xf32> to vector<8x64xf32>
    %135 = vector.extract_strided_slice %132 {offsets = [0, 128], sizes = [8, 64], strides = [1, 1]} : vector<8x256xf32> to vector<8x64xf32>
    %136 = vector.extract_strided_slice %131 {offsets = [0, 192], sizes = [8, 64], strides = [1, 1]} : vector<8x256xf32> to vector<8x64xf32>
    %137 = arith.mulf %134, %120 : vector<8x64xf32>
    %138 = arith.mulf %133, %135 : vector<8x64xf32>
    %139 = arith.addf %137, %138 : vector<8x64xf32>
    %140 = math.tanh %139 : vector<8x64xf32>
    %141 = arith.mulf %136, %140 : vector<8x64xf32>
    %142 = arith.truncf %141 : vector<8x64xf32> to vector<8x64xbf16>
    %cst_23 = arith.constant dense<0.000000e+00> : vector<8x256xf32>
    %143 = tpu.matmul %142, %6, %cst_23 {dimension_numbers = #tpu.dot_dimension_numbers<[1], [0], [0], [1], [0, 0, 1, 1], [], []>} : vector<8x64xbf16>, vector<64x256xbf16>, vector<8x256xf32> -> vector<8x256xf32>
    %144 = vector.extract_strided_slice %5 {offsets = [56, 0], sizes = [8, 256], strides = [1, 1]} : vector<64x256xf32> to vector<8x256xf32>
    %145 = arith.addf %144, %143 : vector<8x256xf32>
    %146 = arith.negf %145 : vector<8x256xf32>
    %147 = math.exp %146 : vector<8x256xf32>
    %cst_24 = arith.constant 1.000000e+00 : f32
    %148 = vector.broadcast %cst_24 : f32 to vector<8x256xf32>
    %149 = arith.addf %148, %147 : vector<8x256xf32>
    %150 = arith.divf %148, %149 : vector<8x256xf32>
    %151 = math.tanh %145 : vector<8x256xf32>
    %152 = vector.extract_strided_slice %150 {offsets = [0, 0], sizes = [8, 64], strides = [1, 1]} : vector<8x256xf32> to vector<8x64xf32>
    %153 = vector.extract_strided_slice %150 {offsets = [0, 64], sizes = [8, 64], strides = [1, 1]} : vector<8x256xf32> to vector<8x64xf32>
    %154 = vector.extract_strided_slice %151 {offsets = [0, 128], sizes = [8, 64], strides = [1, 1]} : vector<8x256xf32> to vector<8x64xf32>
    %155 = vector.extract_strided_slice %150 {offsets = [0, 192], sizes = [8, 64], strides = [1, 1]} : vector<8x256xf32> to vector<8x64xf32>
    %156 = arith.mulf %153, %139 : vector<8x64xf32>
    %157 = arith.mulf %152, %154 : vector<8x64xf32>
    %158 = arith.addf %156, %157 : vector<8x64xf32>
    %159 = math.tanh %158 : vector<8x64xf32>
    %160 = arith.mulf %155, %159 : vector<8x64xf32>
    %161 = vector.extract_strided_slice %27 {offsets = [0, 0], sizes = [8, 32], strides = [1, 1]} : vector<8x64xf32> to vector<8x32xf32>
    %162 = vector.extract_strided_slice %46 {offsets = [0, 0], sizes = [8, 32], strides = [1, 1]} : vector<8x64xf32> to vector<8x32xf32>
    %163 = vector.extract_strided_slice %65 {offsets = [0, 0], sizes = [8, 32], strides = [1, 1]} : vector<8x64xf32> to vector<8x32xf32>
    %164 = vector.extract_strided_slice %84 {offsets = [0, 0], sizes = [8, 32], strides = [1, 1]} : vector<8x64xf32> to vector<8x32xf32>
    %165 = vector.extract_strided_slice %103 {offsets = [0, 0], sizes = [8, 32], strides = [1, 1]} : vector<8x64xf32> to vector<8x32xf32>
    %166 = vector.extract_strided_slice %122 {offsets = [0, 0], sizes = [8, 32], strides = [1, 1]} : vector<8x64xf32> to vector<8x32xf32>
    %167 = vector.extract_strided_slice %141 {offsets = [0, 0], sizes = [8, 32], strides = [1, 1]} : vector<8x64xf32> to vector<8x32xf32>
    %168 = vector.extract_strided_slice %160 {offsets = [0, 0], sizes = [8, 32], strides = [1, 1]} : vector<8x64xf32> to vector<8x32xf32>
    %169 = tpu.concatenate %161, %162, %163, %164, %165, %166, %167, %168 in 0 : vector<8x32xf32>, vector<8x32xf32>, vector<8x32xf32>, vector<8x32xf32>, vector<8x32xf32>, vector<8x32xf32>, vector<8x32xf32>, vector<8x32xf32> -> vector<64x32xf32>
    %170 = vector.extract_strided_slice %160 {offsets = [0, 32], sizes = [8, 32], strides = [1, 1]} : vector<8x64xf32> to vector<8x32xf32>
    %171 = vector.extract_strided_slice %141 {offsets = [0, 32], sizes = [8, 32], strides = [1, 1]} : vector<8x64xf32> to vector<8x32xf32>
    %172 = vector.extract_strided_slice %122 {offsets = [0, 32], sizes = [8, 32], strides = [1, 1]} : vector<8x64xf32> to vector<8x32xf32>
    %173 = vector.extract_strided_slice %103 {offsets = [0, 32], sizes = [8, 32], strides = [1, 1]} : vector<8x64xf32> to vector<8x32xf32>
    %174 = vector.extract_strided_slice %84 {offsets = [0, 32], sizes = [8, 32], strides = [1, 1]} : vector<8x64xf32> to vector<8x32xf32>
    %175 = vector.extract_strided_slice %65 {offsets = [0, 32], sizes = [8, 32], strides = [1, 1]} : vector<8x64xf32> to vector<8x32xf32>
    %176 = vector.extract_strided_slice %46 {offsets = [0, 32], sizes = [8, 32], strides = [1, 1]} : vector<8x64xf32> to vector<8x32xf32>
    %177 = vector.extract_strided_slice %27 {offsets = [0, 32], sizes = [8, 32], strides = [1, 1]} : vector<8x64xf32> to vector<8x32xf32>
    %178 = tpu.concatenate %170, %171, %172, %173, %174, %175, %176, %177 in 0 : vector<8x32xf32>, vector<8x32xf32>, vector<8x32xf32>, vector<8x32xf32>, vector<8x32xf32>, vector<8x32xf32>, vector<8x32xf32>, vector<8x32xf32> -> vector<64x32xf32>
    %c0_25 = arith.constant 0 : index
    %c0_26 = arith.constant 0 : index
    %179 = vector.load %arg4[%c0_25, %c0_26] : memref<64x128xf32, #tpu.memory_space<vmem>>, vector<32x128xf32>
    %cst_27 = arith.constant dense<0.000000e+00> : vector<64x128xf32>
    %180 = tpu.matmul %169, %179, %cst_27 {dimension_numbers = #tpu.dot_dimension_numbers<[1], [0], [0], [1], [0, 0, 1, 1], [], []>} : vector<64x32xf32>, vector<32x128xf32>, vector<64x128xf32> -> vector<64x128xf32>
    %c32 = arith.constant 32 : index
    %c0_28 = arith.constant 0 : index
    %181 = vector.load %arg4[%c32, %c0_28] : memref<64x128xf32, #tpu.memory_space<vmem>>, vector<32x128xf32>
    %cst_29 = arith.constant dense<0.000000e+00> : vector<64x128xf32>
    %182 = tpu.matmul %178, %181, %cst_29 {dimension_numbers = #tpu.dot_dimension_numbers<[1], [0], [0], [1], [0, 0, 1, 1], [], []>} : vector<64x32xf32>, vector<32x128xf32>, vector<64x128xf32> -> vector<64x128xf32>
    %183 = arith.addf %180, %182 : vector<64x128xf32>
    %c0_30 = arith.constant 0 : index
    %c0_31 = arith.constant 0 : index
    %184 = vector.load %arg5[%c0_30, %c0_31] : memref<1x128xf32, #tpu.memory_space<vmem>>, vector<1x128xf32>
    %185 = vector.broadcast %184 : vector<1x128xf32> to vector<64x128xf32>
    %186 = arith.addf %183, %185 : vector<64x128xf32>
    %c0_32 = arith.constant 0 : index
    %c0_33 = arith.constant 0 : index
    %187 = vector.load %arg8[%c0_32, %c0_33] : memref<32x128xbf16, #tpu.memory_space<vmem>>, vector<32x128xbf16>
    %cst_34 = arith.constant 0.000000e+00 : f32
    %188 = vector.broadcast %cst_34 : f32 to vector<8x32xf32>
    %cst_35 = arith.constant 0.000000e+00 : f32
    %189 = vector.broadcast %cst_35 : f32 to vector<8x32xf32>
    %190 = vector.extract_strided_slice %186 {offsets = [0, 0], sizes = [8, 128], strides = [1, 1]} : vector<64x128xf32> to vector<8x128xf32>
    %191 = arith.truncf %188 : vector<8x32xf32> to vector<8x32xbf16>
    %cst_36 = arith.constant dense<0.000000e+00> : vector<8x128xf32>
    %192 = tpu.matmul %191, %187, %cst_36 {dimension_numbers = #tpu.dot_dimension_numbers<[1], [0], [0], [1], [0, 0, 1, 1], [], []>} : vector<8x32xbf16>, vector<32x128xbf16>, vector<8x128xf32> -> vector<8x128xf32>
    %193 = arith.addf %190, %192 : vector<8x128xf32>
    %194 = arith.negf %193 : vector<8x128xf32>
    %195 = math.exp %194 : vector<8x128xf32>
    %cst_37 = arith.constant 1.000000e+00 : f32
    %196 = vector.broadcast %cst_37 : f32 to vector<8x128xf32>
    %197 = arith.addf %196, %195 : vector<8x128xf32>
    %198 = arith.divf %196, %197 : vector<8x128xf32>
    %199 = math.tanh %193 : vector<8x128xf32>
    %200 = vector.extract_strided_slice %198 {offsets = [0, 32], sizes = [8, 32], strides = [1, 1]} : vector<8x128xf32> to vector<8x32xf32>
    %201 = arith.mulf %200, %189 : vector<8x32xf32>
    %202 = vector.extract_strided_slice %198 {offsets = [0, 0], sizes = [8, 32], strides = [1, 1]} : vector<8x128xf32> to vector<8x32xf32>
    %203 = vector.extract_strided_slice %199 {offsets = [0, 64], sizes = [8, 32], strides = [1, 1]} : vector<8x128xf32> to vector<8x32xf32>
    %204 = arith.mulf %202, %203 : vector<8x32xf32>
    %205 = arith.addf %201, %204 : vector<8x32xf32>
    %206 = vector.extract_strided_slice %198 {offsets = [0, 96], sizes = [8, 32], strides = [1, 1]} : vector<8x128xf32> to vector<8x32xf32>
    %207 = math.tanh %205 : vector<8x32xf32>
    %208 = arith.mulf %206, %207 : vector<8x32xf32>
    %209 = vector.extract_strided_slice %186 {offsets = [8, 0], sizes = [8, 128], strides = [1, 1]} : vector<64x128xf32> to vector<8x128xf32>
    %210 = arith.truncf %208 : vector<8x32xf32> to vector<8x32xbf16>
    %cst_38 = arith.constant dense<0.000000e+00> : vector<8x128xf32>
    %211 = tpu.matmul %210, %187, %cst_38 {dimension_numbers = #tpu.dot_dimension_numbers<[1], [0], [0], [1], [0, 0, 1, 1], [], []>} : vector<8x32xbf16>, vector<32x128xbf16>, vector<8x128xf32> -> vector<8x128xf32>
    %212 = arith.addf %209, %211 : vector<8x128xf32>
    %213 = arith.negf %212 : vector<8x128xf32>
    %214 = math.exp %213 : vector<8x128xf32>
    %cst_39 = arith.constant 1.000000e+00 : f32
    %215 = vector.broadcast %cst_39 : f32 to vector<8x128xf32>
    %216 = arith.addf %215, %214 : vector<8x128xf32>
    %217 = arith.divf %215, %216 : vector<8x128xf32>
    %218 = math.tanh %212 : vector<8x128xf32>
    %219 = vector.extract_strided_slice %217 {offsets = [0, 32], sizes = [8, 32], strides = [1, 1]} : vector<8x128xf32> to vector<8x32xf32>
    %220 = arith.mulf %219, %205 : vector<8x32xf32>
    %221 = vector.extract_strided_slice %217 {offsets = [0, 0], sizes = [8, 32], strides = [1, 1]} : vector<8x128xf32> to vector<8x32xf32>
    %222 = vector.extract_strided_slice %218 {offsets = [0, 64], sizes = [8, 32], strides = [1, 1]} : vector<8x128xf32> to vector<8x32xf32>
    %223 = arith.mulf %221, %222 : vector<8x32xf32>
    %224 = arith.addf %220, %223 : vector<8x32xf32>
    %225 = vector.extract_strided_slice %217 {offsets = [0, 96], sizes = [8, 32], strides = [1, 1]} : vector<8x128xf32> to vector<8x32xf32>
    %226 = math.tanh %224 : vector<8x32xf32>
    %227 = arith.mulf %225, %226 : vector<8x32xf32>
    %228 = vector.extract_strided_slice %186 {offsets = [16, 0], sizes = [8, 128], strides = [1, 1]} : vector<64x128xf32> to vector<8x128xf32>
    %229 = arith.truncf %227 : vector<8x32xf32> to vector<8x32xbf16>
    %cst_40 = arith.constant dense<0.000000e+00> : vector<8x128xf32>
    %230 = tpu.matmul %229, %187, %cst_40 {dimension_numbers = #tpu.dot_dimension_numbers<[1], [0], [0], [1], [0, 0, 1, 1], [], []>} : vector<8x32xbf16>, vector<32x128xbf16>, vector<8x128xf32> -> vector<8x128xf32>
    %231 = arith.addf %228, %230 : vector<8x128xf32>
    %232 = arith.negf %231 : vector<8x128xf32>
    %233 = math.exp %232 : vector<8x128xf32>
    %cst_41 = arith.constant 1.000000e+00 : f32
    %234 = vector.broadcast %cst_41 : f32 to vector<8x128xf32>
    %235 = arith.addf %234, %233 : vector<8x128xf32>
    %236 = arith.divf %234, %235 : vector<8x128xf32>
    %237 = math.tanh %231 : vector<8x128xf32>
    %238 = vector.extract_strided_slice %236 {offsets = [0, 32], sizes = [8, 32], strides = [1, 1]} : vector<8x128xf32> to vector<8x32xf32>
    %239 = arith.mulf %238, %224 : vector<8x32xf32>
    %240 = vector.extract_strided_slice %236 {offsets = [0, 0], sizes = [8, 32], strides = [1, 1]} : vector<8x128xf32> to vector<8x32xf32>
    %241 = vector.extract_strided_slice %237 {offsets = [0, 64], sizes = [8, 32], strides = [1, 1]} : vector<8x128xf32> to vector<8x32xf32>
    %242 = arith.mulf %240, %241 : vector<8x32xf32>
    %243 = arith.addf %239, %242 : vector<8x32xf32>
    %244 = vector.extract_strided_slice %236 {offsets = [0, 96], sizes = [8, 32], strides = [1, 1]} : vector<8x128xf32> to vector<8x32xf32>
    %245 = math.tanh %243 : vector<8x32xf32>
    %246 = arith.mulf %244, %245 : vector<8x32xf32>
    %247 = vector.extract_strided_slice %186 {offsets = [24, 0], sizes = [8, 128], strides = [1, 1]} : vector<64x128xf32> to vector<8x128xf32>
    %248 = arith.truncf %246 : vector<8x32xf32> to vector<8x32xbf16>
    %cst_42 = arith.constant dense<0.000000e+00> : vector<8x128xf32>
    %249 = tpu.matmul %248, %187, %cst_42 {dimension_numbers = #tpu.dot_dimension_numbers<[1], [0], [0], [1], [0, 0, 1, 1], [], []>} : vector<8x32xbf16>, vector<32x128xbf16>, vector<8x128xf32> -> vector<8x128xf32>
    %250 = arith.addf %247, %249 : vector<8x128xf32>
    %251 = arith.negf %250 : vector<8x128xf32>
    %252 = math.exp %251 : vector<8x128xf32>
    %cst_43 = arith.constant 1.000000e+00 : f32
    %253 = vector.broadcast %cst_43 : f32 to vector<8x128xf32>
    %254 = arith.addf %253, %252 : vector<8x128xf32>
    %255 = arith.divf %253, %254 : vector<8x128xf32>
    %256 = math.tanh %250 : vector<8x128xf32>
    %257 = vector.extract_strided_slice %255 {offsets = [0, 32], sizes = [8, 32], strides = [1, 1]} : vector<8x128xf32> to vector<8x32xf32>
    %258 = arith.mulf %257, %243 : vector<8x32xf32>
    %259 = vector.extract_strided_slice %255 {offsets = [0, 0], sizes = [8, 32], strides = [1, 1]} : vector<8x128xf32> to vector<8x32xf32>
    %260 = vector.extract_strided_slice %256 {offsets = [0, 64], sizes = [8, 32], strides = [1, 1]} : vector<8x128xf32> to vector<8x32xf32>
    %261 = arith.mulf %259, %260 : vector<8x32xf32>
    %262 = arith.addf %258, %261 : vector<8x32xf32>
    %263 = vector.extract_strided_slice %255 {offsets = [0, 96], sizes = [8, 32], strides = [1, 1]} : vector<8x128xf32> to vector<8x32xf32>
    %264 = math.tanh %262 : vector<8x32xf32>
    %265 = arith.mulf %263, %264 : vector<8x32xf32>
    %266 = vector.extract_strided_slice %186 {offsets = [32, 0], sizes = [8, 128], strides = [1, 1]} : vector<64x128xf32> to vector<8x128xf32>
    %267 = arith.truncf %265 : vector<8x32xf32> to vector<8x32xbf16>
    %cst_44 = arith.constant dense<0.000000e+00> : vector<8x128xf32>
    %268 = tpu.matmul %267, %187, %cst_44 {dimension_numbers = #tpu.dot_dimension_numbers<[1], [0], [0], [1], [0, 0, 1, 1], [], []>} : vector<8x32xbf16>, vector<32x128xbf16>, vector<8x128xf32> -> vector<8x128xf32>
    %269 = arith.addf %266, %268 : vector<8x128xf32>
    %270 = arith.negf %269 : vector<8x128xf32>
    %271 = math.exp %270 : vector<8x128xf32>
    %cst_45 = arith.constant 1.000000e+00 : f32
    %272 = vector.broadcast %cst_45 : f32 to vector<8x128xf32>
    %273 = arith.addf %272, %271 : vector<8x128xf32>
    %274 = arith.divf %272, %273 : vector<8x128xf32>
    %275 = math.tanh %269 : vector<8x128xf32>
    %276 = vector.extract_strided_slice %274 {offsets = [0, 32], sizes = [8, 32], strides = [1, 1]} : vector<8x128xf32> to vector<8x32xf32>
    %277 = arith.mulf %276, %262 : vector<8x32xf32>
    %278 = vector.extract_strided_slice %274 {offsets = [0, 0], sizes = [8, 32], strides = [1, 1]} : vector<8x128xf32> to vector<8x32xf32>
    %279 = vector.extract_strided_slice %275 {offsets = [0, 64], sizes = [8, 32], strides = [1, 1]} : vector<8x128xf32> to vector<8x32xf32>
    %280 = arith.mulf %278, %279 : vector<8x32xf32>
    %281 = arith.addf %277, %280 : vector<8x32xf32>
    %282 = vector.extract_strided_slice %274 {offsets = [0, 96], sizes = [8, 32], strides = [1, 1]} : vector<8x128xf32> to vector<8x32xf32>
    %283 = math.tanh %281 : vector<8x32xf32>
    %284 = arith.mulf %282, %283 : vector<8x32xf32>
    %285 = vector.extract_strided_slice %186 {offsets = [40, 0], sizes = [8, 128], strides = [1, 1]} : vector<64x128xf32> to vector<8x128xf32>
    %286 = arith.truncf %284 : vector<8x32xf32> to vector<8x32xbf16>
    %cst_46 = arith.constant dense<0.000000e+00> : vector<8x128xf32>
    %287 = tpu.matmul %286, %187, %cst_46 {dimension_numbers = #tpu.dot_dimension_numbers<[1], [0], [0], [1], [0, 0, 1, 1], [], []>} : vector<8x32xbf16>, vector<32x128xbf16>, vector<8x128xf32> -> vector<8x128xf32>
    %288 = arith.addf %285, %287 : vector<8x128xf32>
    %289 = arith.negf %288 : vector<8x128xf32>
    %290 = math.exp %289 : vector<8x128xf32>
    %cst_47 = arith.constant 1.000000e+00 : f32
    %291 = vector.broadcast %cst_47 : f32 to vector<8x128xf32>
    %292 = arith.addf %291, %290 : vector<8x128xf32>
    %293 = arith.divf %291, %292 : vector<8x128xf32>
    %294 = math.tanh %288 : vector<8x128xf32>
    %295 = vector.extract_strided_slice %293 {offsets = [0, 32], sizes = [8, 32], strides = [1, 1]} : vector<8x128xf32> to vector<8x32xf32>
    %296 = arith.mulf %295, %281 : vector<8x32xf32>
    %297 = vector.extract_strided_slice %293 {offsets = [0, 0], sizes = [8, 32], strides = [1, 1]} : vector<8x128xf32> to vector<8x32xf32>
    %298 = vector.extract_strided_slice %294 {offsets = [0, 64], sizes = [8, 32], strides = [1, 1]} : vector<8x128xf32> to vector<8x32xf32>
    %299 = arith.mulf %297, %298 : vector<8x32xf32>
    %300 = arith.addf %296, %299 : vector<8x32xf32>
    %301 = vector.extract_strided_slice %293 {offsets = [0, 96], sizes = [8, 32], strides = [1, 1]} : vector<8x128xf32> to vector<8x32xf32>
    %302 = math.tanh %300 : vector<8x32xf32>
    %303 = arith.mulf %301, %302 : vector<8x32xf32>
    %304 = vector.extract_strided_slice %186 {offsets = [48, 0], sizes = [8, 128], strides = [1, 1]} : vector<64x128xf32> to vector<8x128xf32>
    %305 = arith.truncf %303 : vector<8x32xf32> to vector<8x32xbf16>
    %cst_48 = arith.constant dense<0.000000e+00> : vector<8x128xf32>
    %306 = tpu.matmul %305, %187, %cst_48 {dimension_numbers = #tpu.dot_dimension_numbers<[1], [0], [0], [1], [0, 0, 1, 1], [], []>} : vector<8x32xbf16>, vector<32x128xbf16>, vector<8x128xf32> -> vector<8x128xf32>
    %307 = arith.addf %304, %306 : vector<8x128xf32>
    %308 = arith.negf %307 : vector<8x128xf32>
    %309 = math.exp %308 : vector<8x128xf32>
    %cst_49 = arith.constant 1.000000e+00 : f32
    %310 = vector.broadcast %cst_49 : f32 to vector<8x128xf32>
    %311 = arith.addf %310, %309 : vector<8x128xf32>
    %312 = arith.divf %310, %311 : vector<8x128xf32>
    %313 = math.tanh %307 : vector<8x128xf32>
    %314 = vector.extract_strided_slice %312 {offsets = [0, 32], sizes = [8, 32], strides = [1, 1]} : vector<8x128xf32> to vector<8x32xf32>
    %315 = arith.mulf %314, %300 : vector<8x32xf32>
    %316 = vector.extract_strided_slice %312 {offsets = [0, 0], sizes = [8, 32], strides = [1, 1]} : vector<8x128xf32> to vector<8x32xf32>
    %317 = vector.extract_strided_slice %313 {offsets = [0, 64], sizes = [8, 32], strides = [1, 1]} : vector<8x128xf32> to vector<8x32xf32>
    %318 = arith.mulf %316, %317 : vector<8x32xf32>
    %319 = arith.addf %315, %318 : vector<8x32xf32>
    %320 = vector.extract_strided_slice %312 {offsets = [0, 96], sizes = [8, 32], strides = [1, 1]} : vector<8x128xf32> to vector<8x32xf32>
    %321 = math.tanh %319 : vector<8x32xf32>
    %322 = arith.mulf %320, %321 : vector<8x32xf32>
    %323 = vector.extract_strided_slice %186 {offsets = [56, 0], sizes = [8, 128], strides = [1, 1]} : vector<64x128xf32> to vector<8x128xf32>
    %324 = arith.truncf %322 : vector<8x32xf32> to vector<8x32xbf16>
    %cst_50 = arith.constant dense<0.000000e+00> : vector<8x128xf32>
    %325 = tpu.matmul %324, %187, %cst_50 {dimension_numbers = #tpu.dot_dimension_numbers<[1], [0], [0], [1], [0, 0, 1, 1], [], []>} : vector<8x32xbf16>, vector<32x128xbf16>, vector<8x128xf32> -> vector<8x128xf32>
    %326 = arith.addf %323, %325 : vector<8x128xf32>
    %327 = arith.negf %326 : vector<8x128xf32>
    %328 = math.exp %327 : vector<8x128xf32>
    %cst_51 = arith.constant 1.000000e+00 : f32
    %329 = vector.broadcast %cst_51 : f32 to vector<8x128xf32>
    %330 = arith.addf %329, %328 : vector<8x128xf32>
    %331 = arith.divf %329, %330 : vector<8x128xf32>
    %332 = math.tanh %326 : vector<8x128xf32>
    %333 = vector.extract_strided_slice %331 {offsets = [0, 32], sizes = [8, 32], strides = [1, 1]} : vector<8x128xf32> to vector<8x32xf32>
    %334 = arith.mulf %333, %319 : vector<8x32xf32>
    %335 = vector.extract_strided_slice %331 {offsets = [0, 0], sizes = [8, 32], strides = [1, 1]} : vector<8x128xf32> to vector<8x32xf32>
    %336 = vector.extract_strided_slice %332 {offsets = [0, 64], sizes = [8, 32], strides = [1, 1]} : vector<8x128xf32> to vector<8x32xf32>
    %337 = arith.mulf %335, %336 : vector<8x32xf32>
    %338 = arith.addf %334, %337 : vector<8x32xf32>
    %339 = vector.extract_strided_slice %331 {offsets = [0, 96], sizes = [8, 32], strides = [1, 1]} : vector<8x128xf32> to vector<8x32xf32>
    %340 = math.tanh %338 : vector<8x32xf32>
    %341 = arith.mulf %339, %340 : vector<8x32xf32>
    %342 = vector.extract_strided_slice %160 {offsets = [0, 0], sizes = [8, 32], strides = [1, 1]} : vector<8x64xf32> to vector<8x32xf32>
    %c0_52 = arith.constant 0 : index
    %c0_53 = arith.constant 0 : index
    %343 = vector.load %arg6[%c0_52, %c0_53] : memref<64x128xf32, #tpu.memory_space<vmem>>, vector<32x128xf32>
    %cst_54 = arith.constant dense<0.000000e+00> : vector<8x128xf32>
    %344 = tpu.matmul %342, %343, %cst_54 {dimension_numbers = #tpu.dot_dimension_numbers<[1], [0], [0], [1], [0, 0, 1, 1], [], []>} : vector<8x32xf32>, vector<32x128xf32>, vector<8x128xf32> -> vector<8x128xf32>
    %345 = vector.extract_strided_slice %27 {offsets = [0, 32], sizes = [8, 32], strides = [1, 1]} : vector<8x64xf32> to vector<8x32xf32>
    %c32_55 = arith.constant 32 : index
    %c0_56 = arith.constant 0 : index
    %346 = vector.load %arg6[%c32_55, %c0_56] : memref<64x128xf32, #tpu.memory_space<vmem>>, vector<32x128xf32>
    %cst_57 = arith.constant dense<0.000000e+00> : vector<8x128xf32>
    %347 = tpu.matmul %345, %346, %cst_57 {dimension_numbers = #tpu.dot_dimension_numbers<[1], [0], [0], [1], [0, 0, 1, 1], [], []>} : vector<8x32xf32>, vector<32x128xf32>, vector<8x128xf32> -> vector<8x128xf32>
    %348 = arith.addf %344, %347 : vector<8x128xf32>
    %c0_58 = arith.constant 0 : index
    %c0_59 = arith.constant 0 : index
    %349 = vector.load %arg7[%c0_58, %c0_59] : memref<1x128xf32, #tpu.memory_space<vmem>>, vector<1x128xf32>
    %350 = vector.broadcast %349 : vector<1x128xf32> to vector<8x128xf32>
    %351 = arith.addf %348, %350 : vector<8x128xf32>
    %352 = arith.negf %351 : vector<8x128xf32>
    %353 = math.exp %352 : vector<8x128xf32>
    %cst_60 = arith.constant 1.000000e+00 : f32
    %354 = vector.broadcast %cst_60 : f32 to vector<8x128xf32>
    %355 = arith.addf %354, %353 : vector<8x128xf32>
    %356 = arith.divf %354, %355 : vector<8x128xf32>
    %357 = math.tanh %351 : vector<8x128xf32>
    %358 = vector.extract_strided_slice %356 {offsets = [0, 0], sizes = [8, 32], strides = [1, 1]} : vector<8x128xf32> to vector<8x32xf32>
    %359 = vector.extract_strided_slice %357 {offsets = [0, 64], sizes = [8, 32], strides = [1, 1]} : vector<8x128xf32> to vector<8x32xf32>
    %360 = arith.mulf %358, %359 : vector<8x32xf32>
    %361 = vector.extract_strided_slice %356 {offsets = [0, 96], sizes = [8, 32], strides = [1, 1]} : vector<8x128xf32> to vector<8x32xf32>
    %362 = math.tanh %360 : vector<8x32xf32>
    %363 = arith.mulf %361, %362 : vector<8x32xf32>
    %c0_61 = arith.constant 0 : index
    %c0_62 = arith.constant 0 : index
    %364 = vector.load %arg9[%c0_61, %c0_62] : memref<64x256xf32, #tpu.memory_space<vmem>>, vector<32x256xf32>
    %cst_63 = arith.constant dense<0.000000e+00> : vector<8x256xf32>
    %365 = tpu.matmul %341, %364, %cst_63 {dimension_numbers = #tpu.dot_dimension_numbers<[1], [0], [0], [1], [0, 0, 1, 1], [], []>} : vector<8x32xf32>, vector<32x256xf32>, vector<8x256xf32> -> vector<8x256xf32>
    %c32_64 = arith.constant 32 : index
    %c0_65 = arith.constant 0 : index
    %366 = vector.load %arg9[%c32_64, %c0_65] : memref<64x256xf32, #tpu.memory_space<vmem>>, vector<32x256xf32>
    %cst_66 = arith.constant dense<0.000000e+00> : vector<8x256xf32>
    %367 = tpu.matmul %363, %366, %cst_66 {dimension_numbers = #tpu.dot_dimension_numbers<[1], [0], [0], [1], [0, 0, 1, 1], [], []>} : vector<8x32xf32>, vector<32x256xf32>, vector<8x256xf32> -> vector<8x256xf32>
    %368 = arith.addf %365, %367 : vector<8x256xf32>
    %c0_67 = arith.constant 0 : index
    %c0_68 = arith.constant 0 : index
    %369 = vector.load %arg10[%c0_67, %c0_68] : memref<1x256xf32, #tpu.memory_space<vmem>>, vector<1x256xf32>
    %370 = vector.broadcast %369 : vector<1x256xf32> to vector<8x256xf32>
    %371 = arith.addf %368, %370 : vector<8x256xf32>
    %cst_69 = arith.constant 0.000000e+00 : f32
    %372 = vector.broadcast %cst_69 : f32 to vector<8x256xf32>
    %373 = arith.maximumf %371, %372 : vector<8x256xf32>
    %c0_70 = arith.constant 0 : index
    %c0_71 = arith.constant 0 : index
    %374 = vector.load %arg11[%c0_70, %c0_71] : memref<256x128xf32, #tpu.memory_space<vmem>>, vector<256x128xf32>
    %cst_72 = arith.constant dense<0.000000e+00> : vector<8x128xf32>
    %375 = tpu.matmul %373, %374, %cst_72 {dimension_numbers = #tpu.dot_dimension_numbers<[1], [0], [0], [1], [0, 0, 1, 1], [], []>} : vector<8x256xf32>, vector<256x128xf32>, vector<8x128xf32> -> vector<8x128xf32>
    %c0_73 = arith.constant 0 : index
    %c0_74 = arith.constant 0 : index
    %376 = vector.load %arg12[%c0_73, %c0_74] : memref<1x128xf32, #tpu.memory_space<vmem>>, vector<1x128xf32>
    %377 = vector.broadcast %376 : vector<1x128xf32> to vector<8x128xf32>
    %378 = arith.addf %375, %377 : vector<8x128xf32>
    %cst_75 = arith.constant 0.000000e+00 : f32
    %379 = vector.broadcast %cst_75 : f32 to vector<8x128xf32>
    %380 = arith.maximumf %378, %379 : vector<8x128xf32>
    %c0_76 = arith.constant 0 : index
    %c0_77 = arith.constant 0 : index
    %381 = vector.load %arg13[%c0_76, %c0_77] : memref<128x64xf32, #tpu.memory_space<vmem>>, vector<128x64xf32>
    %cst_78 = arith.constant dense<0.000000e+00> : vector<8x64xf32>
    %382 = tpu.matmul %380, %381, %cst_78 {dimension_numbers = #tpu.dot_dimension_numbers<[1], [0], [0], [1], [0, 0, 1, 1], [], []>} : vector<8x128xf32>, vector<128x64xf32>, vector<8x64xf32> -> vector<8x64xf32>
    %c0_79 = arith.constant 0 : index
    %c0_80 = arith.constant 0 : index
    %383 = vector.load %arg14[%c0_79, %c0_80] : memref<1x64xf32, #tpu.memory_space<vmem>>, vector<1x64xf32>
    %384 = vector.broadcast %383 : vector<1x64xf32> to vector<8x64xf32>
    %385 = arith.addf %382, %384 : vector<8x64xf32>
    %cst_81 = arith.constant 0.000000e+00 : f32
    %386 = vector.broadcast %cst_81 : f32 to vector<8x64xf32>
    %387 = arith.maximumf %385, %386 : vector<8x64xf32>
    %c0_82 = arith.constant 0 : index
    %c0_83 = arith.constant 0 : index
    %388 = vector.load %arg15[%c0_82, %c0_83] : memref<1x64xf32, #tpu.memory_space<vmem>>, vector<1x64xf32>
    %389 = vector.broadcast %388 : vector<1x64xf32> to vector<8x64xf32>
    %390 = arith.mulf %387, %389 : vector<8x64xf32>
    %cst_84 = arith.constant dense<0.000000e+00> : vector<8xf32>
    %391 = vector.multi_reduction <add>, %390, %cst_84 [1] : vector<8x64xf32> to vector<8xf32>
    %392 = vector.shape_cast %391 : vector<8xf32> to vector<8x1xf32>
    %c0_85 = arith.constant 0 : index
    %c0_86 = arith.constant 0 : index
    %393 = vector.load %arg16[%c0_85, %c0_86] : memref<1x1xf32, #tpu.memory_space<vmem>>, vector<1x1xf32>
    %394 = vector.broadcast %393 : vector<1x1xf32> to vector<8x1xf32>
    %395 = arith.addf %392, %394 : vector<8x1xf32>
    %396 = arith.negf %395 : vector<8x1xf32>
    %397 = math.exp %396 : vector<8x1xf32>
    %cst_87 = arith.constant 1.000000e+00 : f32
    %398 = vector.broadcast %cst_87 : f32 to vector<8x1xf32>
    %399 = arith.addf %398, %397 : vector<8x1xf32>
    %400 = arith.divf %398, %399 : vector<8x1xf32>
    %c0_88 = arith.constant 0 : index
    %c0_89 = arith.constant 0 : index
    %401 = vector.load %arg17[%c0_88, %c0_89] : memref<8x1xf32, #tpu.memory_space<vmem>>, vector<8x1xf32>
    tpu.vector_store %arg17[%c0_88, %c0_89], %400 {strides = array<i32>} : memref<8x1xf32, #tpu.memory_space<vmem>>, vector<8x1xf32>,
    return
  }
}

</mosaic_0001>

<bundles_post_ra>
// kernel: bilstm_classifier.1
= control target key start
LH: loop header
LB: loop body
LE: loop exit
PB: predicated region body
PF: predicated region fallthrough
CT: control target
= control target key end

     0   :  { %s4036_s0 = inlined_call_operand.vmem [shape: f32[64,128], index: 0, kind: input, shape index: {}]   ;;  %s4037_s1 = inlined_call_operand.vmem [shape: f32[128,256], index: 1, kind: input, shape index: {}]   ;;  %s4038_s2 = inlined_call_operand.vmem [shape: f32[1,256], index: 2, kind: input, shape index: {}]   ;;  %s4039_s3 = inlined_call_operand.hbm [shape: bf16[64,256], index: 3, kind: input, shape index: {}]   ;;  %s4040_s4 = inlined_call_operand.vmem [shape: f32[64,128], index: 4, kind: input, shape index: {}]   ;;  %s4041_s5 = inlined_call_operand.vmem [shape: f32[1,128], index: 5, kind: input, shape index: {}]   ;;  %s4042_s6 = inlined_call_operand.hbm [shape: f32[64,128], index: 6, kind: input, shape index: {}]   ;;  %s4043_s7 = inlined_call_operand.vmem [shape: f32[1,128], index: 7, kind: input, shape index: {}]   ;;  %s4044_s8 = inlined_call_operand.hbm [shape: bf16[32,128], index: 8, kind: input, shape index: {}]   ;;  %s4045_s9 = inlined_call_operand.vmem [shape: f32[64,256], index: 9, kind: input, shape index: {}]   ;;  %s4046_s10 = inlined_call_operand.vmem [shape: f32[1,256], index: 10, kind: input, shape index: {}]   ;;  %s4047_s11 = inlined_call_operand.vmem [shape: f32[256,128], index: 11, kind: input, shape index: {}]   ;;  %s4048_s12 = inlined_call_operand.vmem [shape: f32[1,128], index: 12, kind: input, shape index: {}]   ;;  %s4049_s13 = inlined_call_operand.vmem [shape: f32[128,64], index: 13, kind: input, shape index: {}]   ;;  %s4050_s14 = inlined_call_operand.vmem [shape: f32[1,64], index: 14, kind: input, shape index: {}]   ;;  %s4051_s15 = inlined_call_operand.vmem [shape: f32[1,64], index: 15, kind: input, shape index: {}]   ;;  %s4052_s16 = inlined_call_operand.<no memory space> [shape: f32[1,1], index: 16, kind: input, shape index: {}]   ;;  %s4053_s17 = inlined_call_operand.vmem [shape: f32[8,1], index: 17, kind: output, shape index: {}]  }
   0x1   :  { %4056 = sst [smem:[#allocation10_spill]] %s4036_s0  ;;  %v22_v0 = vstv %s4052_s16 }
   0x2   :  { %4057 = sst [smem:[#allocation11_spill]] %s4037_s1  ;;  %23 = vst [vmem:[#allocation2] sm:$0x1] %v22_v0 }
   0x3   :  { %24 = vsyncpa [#allocation4], 0 }
   0x4   :  { %25 = vsyncpa [#allocation6], 0  ;;  %s3132_s26 = smov [#allocation5]   ;;  %s3133_s28 = smov [#allocation3]  }
   0x5   :  { %s53_s27 = sshll.u32 %s3132_s26, 4  ;;  %s37_s29 = sshll.u32 %s3133_s28, 4  ;;  %s54_s27 = int_to_ptr.vmem [resolvable:$true] %s53_s27  ;;  %s3238_s29 = int_to_ptr.vmem [resolvable:$true] %s37_s29 }
   0x6   :  { %s3062_s18 = scalar_lea.hbm %s4042_s6, 1024 }
   0x7   :  { %p3063_p0 = scmp.ne.s32.totalorder %s4042_s6, %s3062_s18  ;;  %p3066_p1 = scmp.lt.u32.totalorder %s3062_s18, %s4042_s6 }
   0x9   :  { %p3068_p2 = pnand %p3066_p1, %p3063_p0 }
   0xb   :  { %3071 = shalt.err (!%p3068_p2)
}
   0xc   :  { %s3072_s21 = scalar_lea.vmem %s54_s27, 1024  ;;  %p3077_p4 = scmp.lt.s32.totalorder %s54_s27, %s54_s27 }
   0xd   :  { %p3073_p3 = scmp.ne.s32.totalorder %s54_s27, %s3072_s21  ;;  %p3078_p5 = scmp.lt.s32.totalorder %s3072_s21, %s3072_s21 }
   0xf   :  { %p3079_p6 = por %p3078_p5, %p3077_p4 }
  0x11   :  { %p3080_p7 = pnand %p3079_p6, %p3073_p3 }
  0x13   :  { %3083 = shalt.err (!%p3080_p7)
}
  0x14   :  { %s3134_s22 = smov 128   ;;  %s3135_s23 = smov 8  }
  0x15   :  { %59 = dma.hbm_to_vmem [thread:$0]  %s4042_s6, 1024, %s54_s27, [#allocation6], %s3134_s22, %s3134_s22, %s3135_s23  }
  0x16   :  { %s3084_s0 = scalar_lea.hbm %s4039_s3, 1024 }
  0x17   :  { %p3085_p8 = scmp.ne.s32.totalorder %s4039_s3, %s3084_s0  ;;  %p3088_p9 = scmp.lt.u32.totalorder %s3084_s0, %s4039_s3 }
  0x19   :  { %p3090_p10 = pnand %p3088_p9, %p3085_p8 }
  0x1b   :  { %3093 = shalt.err (!%p3090_p10)
}
  0x1c   :  { %s3094_s20 = scalar_lea.vmem %s3238_s29, 1024  ;;  %p3099_p12 = scmp.lt.s32.totalorder %s3238_s29, %s3238_s29 }
  0x1d   :  { %p3095_p11 = scmp.ne.s32.totalorder %s3238_s29, %s3094_s20  ;;  %p3100_p13 = scmp.lt.s32.totalorder %s3094_s20, %s3094_s20 }
  0x1f   :  { %p3101_p0 = por %p3100_p13, %p3099_p12 }
  0x21   :  { %p3102_p1 = pnand %p3101_p0, %p3095_p11 }
  0x23   :  { %3105 = shalt.err (!%p3102_p1)
}
  0x24   :  { %43 = dma.hbm_to_vmem [thread:$0]  %s4039_s3, 1024, %s3238_s29, [#allocation4], %s3134_s22, %s3134_s22, %s3135_s23  }
  0x25   :  { %s3136_s16 = smov [#allocation7]   ;;  %s3106_s26 = scalar_lea.hbm %s4044_s8, 256 }
  0x26   :  { %s67_s21 = sshll.u32 %s3136_s16, 4  ;;  %p3107_p2 = scmp.ne.s32.totalorder %s4044_s8, %s3106_s26  ;;  %s68_s21 = int_to_ptr.vmem [resolvable:$true] %s67_s21 }
  0x27   :  { %p3110_p3 = scmp.lt.u32.totalorder %s3106_s26, %s4044_s8 }
  0x29   :  { %p3112_p4 = pnand %p3110_p3, %p3107_p2 }
  0x2b   :  { %3115 = shalt.err (!%p3112_p4)
}
  0x2c   :  { %s3116_s19 = scalar_lea.vmem %s68_s21, 256  ;;  %p3121_p6 = scmp.lt.s32.totalorder %s68_s21, %s68_s21 }
  0x2d   :  { %p3117_p5 = scmp.ne.s32.totalorder %s68_s21, %s3116_s19  ;;  %p3122_p7 = scmp.lt.s32.totalorder %s3116_s19, %s3116_s19 }
  0x2f   :  { %p3123_p8 = por %p3122_p7, %p3121_p6 }
  0x31   :  { %p3124_p9 = pnand %p3123_p8, %p3117_p5 }
  0x33   :  { %3127 = shalt.err (!%p3124_p9)
}
  0x34   :  { %s3137_s3 = smov 64   ;;  %s3138_s29 = smov 4  }
  0x35   :  { %73 = dma.hbm_to_vmem [thread:$0]  %s4044_s8, 256, %s68_s21, [#allocation6], %s3137_s3, %s3137_s3, %s3138_s29  }
  0x36   :  { %3128 = dma.done.wait [#allocation4], 1024  }
  0x37   :  { %3129 = vsyncadd [#allocation4], 4294966272 }
  0x38   :  { %3130 = dma.done.wait [#allocation6], 1280  }
  0x39   :  { %3131 = vsyncadd [#allocation6], 4294966016  ;;  %v3139_v1 = vmov 0   ;;  %v3140_v2 = vmov 0.0   ;;  %s4058_s6 = sld [smem:[#allocation11_spill]]  ;;  %s4059_s22 = sld [smem:[#allocation10_spill]]  ;;  %v142_v60 = vlaneseq }
  0x3a   :  { %349 = vmatprep.mubr.bf16.mxu1 %v3139_v1  ;;  %216 = vmatprep.mubr.f32.mxu0 %v3140_v2  ;;  %v3327_v22 = vld [vmem:[#allocation3 + $0x4] ss:$8 sps:$4 sm:$0xff]   ;;  %v3329_v23 = vld [vmem:[#allocation3] ss:$8 sps:$4 sm:$0xff]   ;;  %v3332_v25 = vld [vmem:[#allocation3 + $0x14] ss:$8 sps:$4 sm:$0xff]  }
  0x3b   :  { %317 = vmatprep.subr.bf16.mxu1 %v3327_v22  ;;  %v3341_v29 = vld [vmem:[#allocation3 + $0x10] ss:$8 sps:$4 sm:$0xff]   ;;  %v3350_v32 = vld [vmem:[#allocation3 + $0x24] ss:$8 sps:$4 sm:$0xff]   ;;  %v3359_v37 = vld [vmem:[#allocation3 + $0x20] ss:$8 sps:$4 sm:$0xff]  }
  0x3c   :  { %318 = vmatpush1.bf16.msra.mxu1 %v3329_v23  ;;  %v3368_v40 = vld [vmem:[#allocation3 + $0x34] ss:$8 sps:$4 sm:$0xff]   ;;  %v3377_v45 = vld [vmem:[#allocation3 + $0x30] ss:$8 sps:$4 sm:$0xff]   ;;  %v3429_v62 = vshrl.u32 %v142_v60, 7  ;;  %vm313_vm0 = vcmask 523264  }
  0x3d   :  { %319 = vmatprep.subr.bf16.mxu1 %v3332_v25  ;;  %s3141_s19 = smov 32   ;;  %vm3142_vm1 = vmmov 0   ;;  %vm918_vm2 = vcmask 261120   ;;  %vm2366_vm3 = vcmask 7168  }
  0x3f   :  { %v109_v3 = vld [vmem:[%s4058_s6 + $0x8] sm:$0xff]  ;;  %v111_v4 = vld [vmem:[%s4058_s6 + $0x18] sm:$0xff]  ;;  %v108_v5 = vld [vmem:[%s4058_s6] sm:$0xff] }
  0x40   :  { %v2721_v6 = vpack.c.bf16 %v111_v4, %v109_v3  ;;  %v110_v7 = vld [vmem:[%s4058_s6 + $0x10] sm:$0xff]  ;;  %v113_v8 = vld [vmem:[%s4058_s6 + $0x28] sm:$0xff]  ;;  %v115_v9 = vld [vmem:[%s4058_s6 + $0x38] sm:$0xff]  ;;  %320 = vmatpush1.bf16.msra.mxu1 %v3341_v29  ;;  %v144_v4 = vsub.s32 0, %v3429_v62 }
  0x41   :  { %v2723_v10 = vpack.c.bf16 %v110_v7, %v108_v5  ;;  %v2725_v11 = vpack.c.bf16 %v115_v9, %v113_v8  ;;  %v112_v12 = vld [vmem:[%s4058_s6 + $0x20] sm:$0xff]  ;;  %v114_v13 = vld [vmem:[%s4058_s6 + $0x30] sm:$0xff]  ;;  %v117_v14 = vld [vmem:[%s4058_s6 + $0x48] sm:$0xff]  ;;  %321 = vmatprep.subr.bf16.mxu1 %v3350_v32 }
  0x42   :  { %2722 = vmatprep.subr.bf16.mxu0 %v2721_v6  ;;  %v119_v15 = vld [vmem:[%s4058_s6 + $0x58] sm:$0xff]  ;;  %v2727_v16 = vpack.c.bf16 %v114_v13, %v112_v12  ;;  %v116_v17 = vld [vmem:[%s4058_s6 + $0x40] sm:$0xff]  ;;  %v118_v19 = vld [vmem:[%s4058_s6 + $0x50] sm:$0xff]  ;;  %v148_v6 = vsub.s32 1, %v3429_v62 }
  0x43   :  { %2724 = vmatpush1.bf16.msra.mxu0 %v2723_v10  ;;  %v2729_v18 = vpack.c.bf16 %v119_v15, %v117_v14  ;;  %v121_v20 = vld [vmem:[%s4058_s6 + $0x68] sm:$0xff]  ;;  %v123_v21 = vld [vmem:[%s4058_s6 + $0x78] sm:$0xff]  ;;  %v2731_v24 = vpack.c.bf16 %v118_v19, %v116_v17  ;;  %v120_v27 = vld [vmem:[%s4058_s6 + $0x60] sm:$0xff] }
  0x44   :  { %2726 = vmatprep.subr.bf16.mxu0 %v2725_v11  ;;  %v2733_v26 = vpack.c.bf16 %v123_v21, %v121_v20  ;;  %v122_v28 = vld [vmem:[%s4058_s6 + $0x70] sm:$0xff]  ;;  %v125_v30 = vld [vmem:[%s4058_s6 + $0x88] sm:$0xff]  ;;  %v127_v31 = vld [vmem:[%s4058_s6 + $0x98] sm:$0xff]  ;;  %322 = vmatpush1.bf16.msra.mxu1 %v3359_v37 }
  0x45   :  { %v2735_v33 = vpack.c.bf16 %v122_v28, %v120_v27  ;;  %v124_v34 = vld [vmem:[%s4058_s6 + $0x80] sm:$0xff]  ;;  %v126_v35 = vld [vmem:[%s4058_s6 + $0x90] sm:$0xff]  ;;  %v2737_v36 = vpack.c.bf16 %v127_v31, %v125_v30  ;;  %v129_v38 = vld [vmem:[%s4058_s6 + $0xa8] sm:$0xff]  ;;  %323 = vmatprep.subr.bf16.mxu1 %v3368_v40 }
  0x46   :  { %v131_v39 = vld [vmem:[%s4058_s6 + $0xb8] sm:$0xff]  ;;  %v128_v41 = vld [vmem:[%s4058_s6 + $0xa0] sm:$0xff]  ;;  %v2739_v42 = vpack.c.bf16 %v126_v35, %v124_v34  ;;  %v130_v43 = vld [vmem:[%s4058_s6 + $0xb0] sm:$0xff] }
  0x47   :  { %2728 = vmatpush1.bf16.msra.mxu0 %v2727_v16  ;;  %v2741_v44 = vpack.c.bf16 %v131_v39, %v129_v38  ;;  %v133_v46 = vld [vmem:[%s4058_s6 + $0xc8] sm:$0xff]  ;;  %v135_v47 = vld [vmem:[%s4058_s6 + $0xd8] sm:$0xff]  ;;  %v2743_v48 = vpack.c.bf16 %v130_v43, %v128_v41  ;;  %v132_v50 = vld [vmem:[%s4058_s6 + $0xc0] sm:$0xff] }
  0x48   :  { %2730 = vmatprep.subr.bf16.mxu0 %v2729_v18  ;;  %v2745_v49 = vpack.c.bf16 %v135_v47, %v133_v46  ;;  %v134_v51 = vld [vmem:[%s4058_s6 + $0xd0] sm:$0xff]  ;;  %324 = vmatpush1.bf16.msra.mxu1 %v3377_v45  ;;  %v137_v52 = vld [vmem:[%s4058_s6 + $0xe8] sm:$0xff]  ;;  %v139_v53 = vld [vmem:[%s4058_s6 + $0xf8] sm:$0xff] }
  0x49   :  { %389 = vmatprep.subr.bf16.mxu1 %v3327_v22  ;;  %v2747_v54 = vpack.c.bf16 %v134_v51, %v132_v50  ;;  %v2749_v55 = vpack.c.bf16 %v139_v53, %v137_v52  ;;  %v136_v56 = vld [vmem:[%s4058_s6 + $0xe0] sm:$0xff]  ;;  %v138_v57 = vld [vmem:[%s4058_s6 + $0xf0] sm:$0xff]  ;;  %v101_v21 = vld [vmem:[%s4059_s22 + $0x8] sm:$0xff] }
  0x4a   :  { %v2751_v58 = vpack.c.bf16 %v138_v57, %v136_v56  ;;  %v100_v59 = vld [vmem:[%s4059_s22] sm:$0xff]  ;;  %v102_v57 = vld [vmem:[%s4059_s22 + $0x10] sm:$0xff] }
  0x4b   :  { %2732 = vmatpush1.bf16.msra.mxu0 %v2731_v24  ;;  %350 = vmatmul.mubr.bf16.vlgmr.msra.gmra.mrb[0].mxu1 %v3139_v1  ;;  %v140_v5 = vld [vmem:[%s4038_s2] sm:$0x3]  ;;  %v2261_v62 = vld [vmem:[%s4049_s13 + $0x70] sm:$0xff] }
  0x4c   :  { %2734 = vmatprep.subr.bf16.mxu0 %v2733_v26  ;;  %390 = vmatpush1.bf16.msra.mxu1 %v3329_v23  ;;  %v3438_v7 = vrot.slane %v140_v5, %v144_v4  ;;  %v3442_v8 = vrot.slane %v140_v5, %v148_v6 }
  0x4d   :  { %391 = vmatprep.subr.bf16.mxu1 %v3332_v25  ;;  %421 = vmatprep.mubr.bf16.mxu1 %v3139_v1 }
  0x4f   :  { %2736 = vmatpush1.bf16.msra.mxu0 %v2735_v33 }
  0x50   :  { %2738 = vmatprep.subr.bf16.mxu0 %v2737_v36  ;;  %392 = vmatpush1.bf16.msra.mxu1 %v3341_v29 }
  0x51   :  { %393 = vmatprep.subr.bf16.mxu1 %v3350_v32 }
  0x53   :  { %2740 = vmatpush1.bf16.msra.mxu0 %v2739_v42 }
  0x54   :  { %2742 = vmatprep.subr.bf16.mxu0 %v2741_v44  ;;  %394 = vmatpush1.bf16.msra.mxu1 %v3359_v37 }
  0x55   :  { %395 = vmatprep.subr.bf16.mxu1 %v3368_v40 }
  0x57   :  { %2744 = vmatpush1.bf16.msra.mxu0 %v2743_v48 }
  0x58   :  { %2746 = vmatprep.subr.bf16.mxu0 %v2745_v49  ;;  %396 = vmatpush1.bf16.msra.mxu1 %v3377_v45 }
  0x59   :  { %461 = vmatprep.subr.bf16.mxu1 %v3327_v22 }
  0x5b   :  { %2748 = vmatpush1.bf16.msra.mxu0 %v2747_v54 }
  0x5c   :  { %2750 = vmatprep.subr.bf16.mxu0 %v2749_v55 }
  0x5f   :  { %2752 = vmatpush1.bf16.msra.mxu0 %v2751_v58 }
  0x60   :  { %533 = vmatprep.subr.bf16.mxu0 %v3327_v22 }
  0x62   :  { %217 = vmatmul.mubr.f32.vlgmr.msra.gmra.mrb[0].mxu0 %v100_v59 }
  0x63   :  { %222 = vmatprep.mubr.f32.mxu0 %v3140_v2  ;;  %534 = vmatpush1.bf16.msra.mxu0 %v3329_v23 }
  0x64   :  { %535 = vmatprep.subr.bf16.mxu0 %v3332_v25 }
  0x66   :  { %223 = vmatmul.mubr.f32.gmra.mrb[2].mxu0 %v101_v21 }
  0x67   :  { %536 = vmatpush1.bf16.msra.mxu0 %v3341_v29  ;;  %228 = vmatprep.mubr.f32.mxu0 %v3140_v2 }
  0x68   :  { %537 = vmatprep.subr.bf16.mxu0 %v3350_v32 }
  0x6a   :  { %229 = vmatmul.mubr.f32.gmra.mrb[4].mxu0 %v102_v57 }
  0x6b   :  { %538 = vmatpush1.bf16.msra.mxu0 %v3359_v37  ;;  %234 = vmatprep.mubr.f32.mxu0 %v3140_v2 }
  0x6c   :  { %539 = vmatprep.subr.bf16.mxu0 %v3368_v40 }
  0x6f   :  { %540 = vmatpush1.bf16.msra.mxu0 %v3377_v45 }
  0x70   :  { %677 = vmatprep.subr.bf16.mxu0 %v3327_v22 }
 0x11e   :  { %v351_v61 = vpop.f32.mrb[0].mxu1 }
 0x11f   :  { %v353_v63 = vpop.f32.mrb[1].mxu1 }
 0x120   :  { %v355_v0 = vpop.f32.mrb[2].mxu1 }
 0x121   :  { %v356_v3 = vpop.f32.mrb[3].mxu1 }
 0x135   :  { %v218_v9 = vpop.f32.mrb[0].mxu0 }
 0x136   :  { %v219_v10 = vadd.f32 %v218_v9, %v3438_v7  ;;  %v220_v11 = vpop.f32.mrb[1].mxu0 }
 0x137   :  { %v221_v12 = vadd.f32 %v220_v11, %v3442_v8 }
 0x138   :  { %v358_v13 = vadd.f32 %v351_v61, %v219_v10 }
 0x139   :  { %v359_v14 = vadd.f32 %v353_v63, %v221_v12  ;;  %v224_v38 = vpop.f32.mrb[2].mxu0 }
 0x13a   :  { %v2382_v15 = vmul.f32 -1.442695, %v358_v13  ;;  %v226_v39 = vpop.f32.mrb[3].mxu0  ;;  %v225_v42 = vadd.f32 %v224_v38, %v3438_v7  ;;  %v106_v38 = vld [vmem:[%s4059_s22 + $0x30] sm:$0xff] }
 0x13b   :  { %v2383_v24 = vmul.f32 -1.442695, %v359_v14  ;;  %v227_v43 = vadd.f32 %v226_v39, %v3442_v8  ;;  %v107_v39 = vld [vmem:[%s4059_s22 + $0x38] sm:$0xff] }
 0x13c   :  { %2890 = vpow2.f32 %v2382_v15 }
 0x13d   :  { %2892 = vtanh.f32 %v359_v14  ;;  %v230_v11 = vpop.f32.mrb[4].mxu0 }
 0x13e   :  { %v232_v12 = vpop.f32.mrb[5].mxu0  ;;  %v231_v14 = vadd.f32 %v230_v11, %v3438_v7 }
 0x13f   :  { %v233_v15 = vadd.f32 %v232_v12, %v3442_v8 }
 0x146   :  { %v2891_v16 = vpop.eup %2890 }
 0x147   :  { %v366_v17 = vadd.f32 1.0, %v2891_v16  ;;  %v2893_v18 = vpop.eup %2892 }
 0x149   :  { %2894 = vrcp.f32 %v366_v17 }
 0x14a   :  { %2896 = vpow2.f32 %v2383_v24 }
 0x153   :  { %v2895_v19 = vpop.eup %2894 }
 0x154   :  { %v374_v20 = vmul.f32 %v2895_v19, %v2893_v18  ;;  %v2897_v26 = vpop.eup %2896  ;;  %v373_v28 = vmul.f32 0.0, %v2895_v19 }
 0x155   :  { %v367_v27 = vadd.f32 1.0, %v2897_v26 }
 0x156   :  { %376 = vrot.lane.b32.xlu0 %v374_v20, %s3137_s3 }
 0x157   :  { %2898 = vrcp.f32 %v367_v27 }
 0x161   :  { %v2899_v33 = vpop.eup %2898 }
 0x1c8   :  { %v377_v30 = vpop.permute.xlu0 %376 }
 0x1c9   :  { %v379_v31 = vadd.f32 %v377_v30, %v373_v28 }
 0x1cb   :  { %2900 = vtanh.f32 %v379_v31 }
 0x1d5   :  { %v2901_v34 = vpop.eup %2900 }
 0x1d6   :  { %v3451_v35 = vmul.f32 %v2901_v34, %v2899_v33  ;;  %v103_v33 = vld [vmem:[%s4059_s22 + $0x18] sm:$0xff]  ;;  %v104_v34 = vld [vmem:[%s4059_s22 + $0x20] sm:$0xff] }
 0x1d7   :  { %235 = vmatmul.mubr.f32.gmra.mrb[6].mxu0 %v103_v33 }
 0x1d8   :  { %v382_v36 = vpack.c.bf16 %v3451_v35, %v3451_v35  ;;  %240 = vmatprep.mubr.f32.mxu0 %v3140_v2 }
 0x1da   :  { %384 = vrot.lane.b32.xlu0 %v382_v36, %s3137_s3  ;;  %v105_v36 = vld [vmem:[%s4059_s22 + $0x28] sm:$0xff] }
 0x1db   :  { %241 = vmatmul.mubr.f32.gmra.mrb[8].mxu0 %v104_v34 }
 0x1dc   :  { %246 = vmatprep.mubr.f32.mxu0 %v3140_v2 }
 0x1df   :  { %247 = vmatmul.mubr.f32.gmra.mrb[10].mxu0 %v105_v36 }
 0x1e0   :  { %252 = vmatprep.mubr.f32.mxu0 %v3140_v2 }
 0x1e3   :  { %253 = vmatmul.mubr.f32.gmra.mrb[12].mxu0 %v106_v38 }
 0x1e4   :  { %258 = vmatprep.mubr.f32.mxu0 %v3140_v2 }
 0x1e7   :  { %259 = vmatmul.mubr.f32.gmra.mrb[14].mxu0 %v107_v39 }
 0x1e8   :  { %565 = vmatprep.mubr.bf16.mxu0 %v3139_v1 }
 0x24c   :  { %v385_v41 = vpop.permute.xlu0 %384 }
 0x24d   :  { %2384 = vmatmul.mubr.msk.bf16.vlgmr.msra.gmra.mrb[4].mxu1 %vm313_vm0, %v385_v41 }
 0x24e   :  { %462 = vmatpush1.bf16.msra.mxu1 %v3329_v23  ;;  %493 = vmatprep.mubr.bf16.mxu1 %v3139_v1 }
 0x24f   :  { %463 = vmatprep.subr.bf16.mxu1 %v3332_v25 }
 0x252   :  { %464 = vmatpush1.bf16.msra.mxu1 %v3341_v29 }
 0x253   :  { %465 = vmatprep.subr.bf16.mxu1 %v3350_v32 }
 0x256   :  { %466 = vmatpush1.bf16.msra.mxu1 %v3359_v37 }
 0x257   :  { %467 = vmatprep.subr.bf16.mxu1 %v3368_v40 }
 0x25a   :  { %468 = vmatpush1.bf16.msra.mxu1 %v3377_v45 }
 0x25b   :  { %605 = vmatprep.subr.bf16.mxu1 %v3327_v22 }
 0x320   :  { %v423_v44 = vpop.f32.mrb[4].mxu1 }
 0x321   :  { %v430_v46 = vadd.f32 %v423_v44, %v225_v42  ;;  %v425_v47 = vpop.f32.mrb[5].mxu1 }
 0x322   :  { %v431_v48 = vadd.f32 %v425_v47, %v227_v43  ;;  %v427_v49 = vpop.f32.mrb[6].mxu1 }
 0x323   :  { %v2385_v50 = vmul.f32 -1.442695, %v430_v46  ;;  %v428_v51 = vpop.f32.mrb[7].mxu1 }
 0x324   :  { %v2386_v58 = vmul.f32 -1.442695, %v431_v48 }
 0x325   :  { %2902 = vpow2.f32 %v2385_v50 }
 0x326   :  { %2904 = vtanh.f32 %v431_v48 }
 0x32f   :  { %v2903_v52 = vpop.eup %2902 }
 0x330   :  { %v438_v53 = vadd.f32 1.0, %v2903_v52  ;;  %v2905_v54 = vpop.eup %2904  ;;  %v236_v52 = vpop.f32.mrb[6].mxu0 }
 0x332   :  { %2906 = vrcp.f32 %v438_v53  ;;  %v238_v53 = vpop.f32.mrb[7].mxu0 }
 0x333   :  { %2908 = vpow2.f32 %v2386_v58 }
 0x33c   :  { %v2907_v55 = vpop.eup %2906 }
 0x33d   :  { %v446_v56 = vmul.f32 %v2907_v55, %v2905_v54  ;;  %v2909_v59 = vpop.eup %2908  ;;  %v445_v61 = vmul.f32 %v2907_v55, %v379_v31  ;;  %v242_v54 = vpop.f32.mrb[8].mxu0 }
 0x33e   :  { %v439_v60 = vadd.f32 1.0, %v2909_v59  ;;  %v244_v55 = vpop.f32.mrb[9].mxu0  ;;  %v243_v38 = vadd.f32 %v242_v54, %v3438_v7 }
 0x33f   :  { %448 = vrot.lane.b32.xlu1 %v446_v56, %s3137_s3  ;;  %v3516_v56 = vpop.f32.mrb[10].mxu0  ;;  %v245_v39 = vadd.f32 %v244_v55, %v3442_v8 }
 0x340   :  { %2910 = vrcp.f32 %v439_v60  ;;  %v3518_v57 = vpop.f32.mrb[11].mxu0 }
 0x341   :  { %v3520_v58 = vpop.f32.mrb[12].mxu0 }
 0x342   :  { %v3522_v59 = vpop.f32.mrb[13].mxu0 }
 0x343   :  { %v3524_v60 = vpop.f32.mrb[14].mxu0 }
 0x34a   :  { %v2911_v3 = vpop.eup %2910 }
 0x3b1   :  { %v449_v63 = vpop.permute.xlu1 %448 }
 0x3b2   :  { %v451_v0 = vadd.f32 %v449_v63, %v445_v61  ;;  %v3526_v61 = vpop.f32.mrb[15].mxu0 }
 0x3b4   :  { %2912 = vtanh.f32 %v451_v0 }
 0x3be   :  { %v2913_v5 = vpop.eup %2912 }
 0x3bf   :  { %v3473_v9 = vmul.f32 %v2913_v5, %v2911_v3  ;;  %v239_v3 = vadd.f32 %v238_v53, %v3442_v8 }
 0x3c1   :  { %v454_v10 = vpack.c.bf16 %v3473_v9, %v3473_v9 }
 0x3c3   :  { %456 = vrot.lane.b32.xlu1 %v454_v10, %s3137_s3 }
 0x435   :  { %v457_v13 = vpop.permute.xlu1 %456 }
 0x436   :  { %2387 = vmatmul.mubr.msk.bf16.vlgmr.msra.gmra.mrb[8].mxu1 %vm313_vm0, %v457_v13 }
 0x437   :  { %606 = vmatpush1.bf16.msra.mxu1 %v3329_v23  ;;  %637 = vmatprep.mubr.bf16.mxu1 %v3139_v1 }
 0x438   :  { %607 = vmatprep.subr.bf16.mxu1 %v3332_v25 }
 0x43b   :  { %608 = vmatpush1.bf16.msra.mxu1 %v3341_v29 }
 0x43c   :  { %609 = vmatprep.subr.bf16.mxu1 %v3350_v32 }
 0x43f   :  { %610 = vmatpush1.bf16.msra.mxu1 %v3359_v37 }
 0x440   :  { %611 = vmatprep.subr.bf16.mxu1 %v3368_v40 }
 0x443   :  { %612 = vmatpush1.bf16.msra.mxu1 %v3377_v45 }
 0x444   :  { %749 = vmatprep.subr.bf16.mxu1 %v3327_v22 }
 0x509   :  { %v495_v16 = vpop.f32.mrb[8].mxu1 }
 0x50a   :  { %v502_v17 = vadd.f32 %v495_v16, %v231_v14  ;;  %v497_v18 = vpop.f32.mrb[9].mxu1 }
 0x50b   :  { %v503_v19 = vadd.f32 %v497_v18, %v233_v15  ;;  %v499_v20 = vpop.f32.mrb[10].mxu1 }
 0x50c   :  { %v2388_v21 = vmul.f32 -1.442695, %v502_v17  ;;  %v500_v24 = vpop.f32.mrb[11].mxu1 }
 0x50d   :  { %v2389_v41 = vmul.f32 -1.442695, %v503_v19 }
 0x50e   :  { %2914 = vpow2.f32 %v2388_v21 }
 0x50f   :  { %2916 = vtanh.f32 %v503_v19 }
 0x518   :  { %v2915_v26 = vpop.eup %2914 }
 0x519   :  { %v510_v27 = vadd.f32 1.0, %v2915_v26  ;;  %v2917_v28 = vpop.eup %2916 }
 0x51b   :  { %2918 = vrcp.f32 %v510_v27 }
 0x51c   :  { %2920 = vpow2.f32 %v2389_v41 }
 0x525   :  { %v2919_v30 = vpop.eup %2918 }
 0x526   :  { %v518_v31 = vmul.f32 %v2919_v30, %v2917_v28  ;;  %v2921_v42 = vpop.eup %2920  ;;  %v517_v44 = vmul.f32 %v2919_v30, %v451_v0  ;;  %v237_v0 = vadd.f32 %v236_v52, %v3438_v7 }
 0x527   :  { %v511_v43 = vadd.f32 1.0, %v2921_v42 }
 0x528   :  { %520 = vrot.lane.b32.xlu0 %v518_v31, %s3137_s3 }
 0x529   :  { %2922 = vrcp.f32 %v511_v43 }
 0x533   :  { %v2923_v48 = vpop.eup %2922 }
 0x59a   :  { %v521_v46 = vpop.permute.xlu0 %520 }
 0x59b   :  { %v523_v47 = vadd.f32 %v521_v46, %v517_v44 }
 0x59d   :  { %2924 = vtanh.f32 %v523_v47 }
 0x5a7   :  { %v2925_v49 = vpop.eup %2924 }
 0x5a8   :  { %v3511_v50 = vmul.f32 %v2925_v49, %v2923_v48 }
 0x5aa   :  { %v526_v51 = vpack.c.bf16 %v3511_v50, %v3511_v50 }
 0x5ac   :  { %528 = vrot.lane.b32.xlu1 %v526_v51, %s3137_s3 }
 0x61e   :  { %v529_v63 = vpop.permute.xlu1 %528 }
 0x61f   :  { %2390 = vmatmul.mubr.msk.bf16.vlgmr.msra.gmra.mrb[16].mxu0 %vm313_vm0, %v529_v63 }
 0x620   :  { %678 = vmatpush1.bf16.msra.mxu0 %v3329_v23  ;;  %709 = vmatprep.mubr.bf16.mxu0 %v3139_v1 }
 0x621   :  { %679 = vmatprep.subr.bf16.mxu0 %v3332_v25 }
 0x624   :  { %680 = vmatpush1.bf16.msra.mxu0 %v3341_v29 }
 0x625   :  { %681 = vmatprep.subr.bf16.mxu0 %v3350_v32 }
 0x628   :  { %682 = vmatpush1.bf16.msra.mxu0 %v3359_v37 }
 0x629   :  { %683 = vmatprep.subr.bf16.mxu0 %v3368_v40 }
 0x62c   :  { %684 = vmatpush1.bf16.msra.mxu0 %v3377_v45 }
 0x62d   :  { %821 = vmatprep.subr.bf16.mxu0 %v3327_v22 }
 0x6f2   :  { %v567_v5 = vpop.f32.mrb[16].mxu0 }
 0x6f3   :  { %v574_v10 = vadd.f32 %v567_v5, %v237_v0  ;;  %v569_v11 = vpop.f32.mrb[17].mxu0 }
 0x6f4   :  { %v575_v12 = vadd.f32 %v569_v11, %v239_v3  ;;  %v571_v13 = vpop.f32.mrb[18].mxu0 }
 0x6f5   :  { %v2391_v14 = vmul.f32 -1.442695, %v574_v10  ;;  %v572_v15 = vpop.f32.mrb[19].mxu0 }
 0x6f6   :  { %v2392_v22 = vmul.f32 -1.442695, %v575_v12 }
 0x6f7   :  { %2926 = vpow2.f32 %v2391_v14 }
 0x6f8   :  { %2928 = vtanh.f32 %v575_v12 }
 0x701   :  { %v2927_v16 = vpop.eup %2926 }
 0x702   :  { %v582_v17 = vadd.f32 1.0, %v2927_v16  ;;  %v2929_v18 = vpop.eup %2928  ;;  %v249_v16 = vadd.f32 %v3516_v56, %v3438_v7 }
 0x704   :  { %2930 = vrcp.f32 %v582_v17 }
 0x705   :  { %2932 = vpow2.f32 %v2392_v22 }
 0x70e   :  { %v2931_v19 = vpop.eup %2930 }
 0x70f   :  { %v590_v20 = vmul.f32 %v2931_v19, %v2929_v18  ;;  %v2933_v21 = vpop.eup %2932  ;;  %v589_v26 = vmul.f32 %v2931_v19, %v523_v47 }
 0x710   :  { %v583_v24 = vadd.f32 1.0, %v2933_v21 }
 0x711   :  { %592 = vrot.lane.b32.xlu0 %v590_v20, %s3137_s3 }
 0x712   :  { %2934 = vrcp.f32 %v583_v24 }
 0x71c   :  { %v2935_v30 = vpop.eup %2934 }
 0x783   :  { %v593_v27 = vpop.permute.xlu0 %592 }
 0x784   :  { %v595_v28 = vadd.f32 %v593_v27, %v589_v26 }
 0x786   :  { %2936 = vtanh.f32 %v595_v28 }
 0x790   :  { %v2937_v31 = vpop.eup %2936 }
 0x791   :  { %v3541_v33 = vmul.f32 %v2937_v31, %v2935_v30 }
 0x793   :  { %v598_v34 = vpack.c.bf16 %v3541_v33, %v3541_v33 }
 0x795   :  { %600 = vrot.lane.b32.xlu1 %v598_v34, %s3137_s3 }
 0x807   :  { %v601_v36 = vpop.permute.xlu1 %600 }
 0x808   :  { %2393 = vmatmul.mubr.msk.bf16.vlgmr.msra.gmra.mrb[12].mxu1 %vm313_vm0, %v601_v36 }
 0x809   :  { %750 = vmatpush1.bf16.msra.mxu1 %v3329_v23  ;;  %781 = vmatprep.mubr.bf16.mxu1 %v3139_v1 }
 0x80a   :  { %751 = vmatprep.subr.bf16.mxu1 %v3332_v25 }
 0x80d   :  { %752 = vmatpush1.bf16.msra.mxu1 %v3341_v29 }
 0x80e   :  { %753 = vmatprep.subr.bf16.mxu1 %v3350_v32 }
 0x811   :  { %754 = vmatpush1.bf16.msra.mxu1 %v3359_v37 }
 0x812   :  { %755 = vmatprep.subr.bf16.mxu1 %v3368_v40 }
 0x815   :  { %756 = vmatpush1.bf16.msra.mxu1 %v3377_v45 }
 0x8db   :  { %v639_v41 = vpop.f32.mrb[12].mxu1 }
 0x8dc   :  { %v646_v42 = vadd.f32 %v639_v41, %v243_v38  ;;  %v641_v43 = vpop.f32.mrb[13].mxu1  ;;  %v257_v41 = vadd.f32 %v3522_v59, %v3442_v8 }
 0x8dd   :  { %v647_v44 = vadd.f32 %v641_v43, %v245_v39  ;;  %v643_v46 = vpop.f32.mrb[14].mxu1  ;;  %v255_v39 = vadd.f32 %v3520_v58, %v3438_v7 }
 0x8de   :  { %v2394_v47 = vmul.f32 -1.442695, %v646_v42  ;;  %v644_v48 = vpop.f32.mrb[15].mxu1 }
 0x8df   :  { %v2395_v54 = vmul.f32 -1.442695, %v647_v44 }
 0x8e0   :  { %2938 = vpow2.f32 %v2394_v47 }
 0x8e1   :  { %2940 = vtanh.f32 %v647_v44 }
 0x8ea   :  { %v2939_v49 = vpop.eup %2938 }
 0x8eb   :  { %v654_v51 = vadd.f32 1.0, %v2939_v49  ;;  %v2941_v52 = vpop.eup %2940 }
 0x8ed   :  { %2942 = vrcp.f32 %v654_v51 }
 0x8ee   :  { %2944 = vpow2.f32 %v2395_v54 }
 0x8f7   :  { %v2943_v53 = vpop.eup %2942 }
 0x8f8   :  { %v662_v63 = vmul.f32 %v2943_v53, %v2941_v52  ;;  %v2945_v55 = vpop.eup %2944  ;;  %v661_v3 = vmul.f32 %v2943_v53, %v595_v28 }
 0x8f9   :  { %v655_v0 = vadd.f32 1.0, %v2945_v55 }
 0x8fa   :  { %664 = vrot.lane.b32.xlu0 %v662_v63, %s3137_s3 }
 0x8fb   :  { %2946 = vrcp.f32 %v655_v0 }
 0x905   :  { %v2947_v11 = vpop.eup %2946 }
 0x96c   :  { %v665_v5 = vpop.permute.xlu0 %664 }
 0x96d   :  { %v667_v10 = vadd.f32 %v665_v5, %v661_v3 }
 0x96f   :  { %2948 = vtanh.f32 %v667_v10 }
 0x979   :  { %v2949_v12 = vpop.eup %2948 }
 0x97a   :  { %v3558_v13 = vmul.f32 %v2949_v12, %v2947_v11 }
 0x97c   :  { %v670_v14 = vpack.c.bf16 %v3558_v13, %v3558_v13 }
 0x97e   :  { %672 = vrot.lane.b32.xlu1 %v670_v14, %s3137_s3 }
 0x9f0   :  { %v673_v15 = vpop.permute.xlu1 %672 }
 0x9f1   :  { %2396 = vmatmul.mubr.msk.bf16.vlgmr.msra.gmra.mrb[20].mxu0 %vm313_vm0, %v673_v15 }
 0x9f2   :  { %822 = vmatpush1.bf16.msra.mxu0 %v3329_v23  ;;  %853 = vmatprep.mubr.bf16.mxu0 %v3139_v1  ;;  %v251_v23 = vadd.f32 %v3518_v57, %v3442_v8 }
 0x9f3   :  { %823 = vmatprep.subr.bf16.mxu0 %v3332_v25 }
 0x9f6   :  { %824 = vmatpush1.bf16.msra.mxu0 %v3341_v29 }
 0x9f7   :  { %825 = vmatprep.subr.bf16.mxu0 %v3350_v32 }
 0x9fa   :  { %826 = vmatpush1.bf16.msra.mxu0 %v3359_v37 }
 0x9fb   :  { %827 = vmatprep.subr.bf16.mxu0 %v3368_v40 }
 0x9fe   :  { %828 = vmatpush1.bf16.msra.mxu0 %v3377_v45 }
 0x9ff   :  { %2608 = vmatprep.subr.bf16.mxu0 %v3140_v2 }
 0xac4   :  { %v711_v17 = vpop.f32.mrb[20].mxu0 }
 0xac5   :  { %v718_v25 = vadd.f32 %v711_v17, %v249_v16  ;;  %v713_v18 = vpop.f32.mrb[21].mxu0  ;;  %v261_v16 = vadd.f32 %v3524_v60, %v3438_v7  ;;  %v890_v7 = vld [vmem:[%s4040_s4 + $0x20] sm:$0xff]  ;;  %v892_v60 = vld [vmem:[%s4040_s4 + $0x30] sm:$0xff] }
 0xac6   :  { %v719_v29 = vadd.f32 %v713_v18, %v251_v23  ;;  %v715_v19 = vpop.f32.mrb[22].mxu0  ;;  %v263_v23 = vadd.f32 %v3526_v61, %v3442_v8  ;;  %v891_v8 = vld [vmem:[%s4040_s4 + $0x28] sm:$0xff] }
 0xac7   :  { %v2397_v32 = vmul.f32 -1.442695, %v718_v25  ;;  %v716_v20 = vpop.f32.mrb[23].mxu0  ;;  %v2753_v61 = vpack.c.bf16 %v891_v8, %v890_v7 }
 0xac8   :  { %v2398_v56 = vmul.f32 -1.442695, %v719_v29 }
 0xac9   :  { %2950 = vpow2.f32 %v2397_v32  ;;  %2754 = vmatprep.subr.bf16.mxu1 %v2753_v61 }
 0xaca   :  { %2952 = vtanh.f32 %v719_v29 }
 0xad3   :  { %v2951_v37 = vpop.eup %2950 }
 0xad4   :  { %v726_v40 = vadd.f32 1.0, %v2951_v37  ;;  %v2953_v45 = vpop.eup %2952 }
 0xad6   :  { %2954 = vrcp.f32 %v726_v40 }
 0xad7   :  { %2956 = vpow2.f32 %v2398_v56  ;;  %v893_v56 = vld [vmem:[%s4040_s4 + $0x38] sm:$0xff] }
 0xae0   :  { %v2955_v22 = vpop.eup %2954 }
 0xae1   :  { %v734_v21 = vmul.f32 %v2955_v22, %v2953_v45  ;;  %v2957_v57 = vpop.eup %2956  ;;  %v733_v26 = vmul.f32 %v2955_v22, %v667_v10 }
 0xae2   :  { %v727_v24 = vadd.f32 1.0, %v2957_v57  ;;  %v2757_v57 = vpack.c.bf16 %v893_v56, %v892_v60 }
 0xae3   :  { %736 = vrot.lane.b32.xlu0 %v734_v21, %s3137_s3 }
 0xae4   :  { %2958 = vrcp.f32 %v727_v24 }
 0xaee   :  { %v2959_v30 = vpop.eup %2958 }
 0xb55   :  { %v737_v27 = vpop.permute.xlu0 %736 }
 0xb56   :  { %v739_v28 = vadd.f32 %v737_v27, %v733_v26 }
 0xb58   :  { %2960 = vtanh.f32 %v739_v28 }
 0xb62   :  { %v2961_v31 = vpop.eup %2960 }
 0xb63   :  { %v3578_v34 = vmul.f32 %v2961_v31, %v2959_v30 }
 0xb65   :  { %v742_v36 = vpack.c.bf16 %v3578_v34, %v3578_v34 }
 0xb67   :  { %744 = vrot.lane.b32.xlu1 %v742_v36, %s3137_s3  ;;  %v886_v36 = vld [vmem:[%s4040_s4] sm:$0xff] }
 0xbd9   :  { %v745_v38 = vpop.permute.xlu1 %744 }
 0xbda   :  { %2399 = vmatmul.mubr.msk.bf16.vlgmr.msra.gmra.mrb[16].mxu1 %vm313_vm0, %v745_v38  ;;  %v887_v38 = vld [vmem:[%s4040_s4 + $0x8] sm:$0xff] }
 0xbdb   :  { %2756 = vmatpush3.bf16.msra.mxu1 %v2753_v61 }
 0xbdc   :  { %2758 = vmatprep.subr.bf16.mxu1 %v2757_v57 }
 0xbdf   :  { %2760 = vmatpush3.bf16.msra.mxu1 %v2757_v57 }
 0xcad   :  { %v783_v42 = vpop.f32.mrb[16].mxu1 }
 0xcae   :  { %v790_v43 = vadd.f32 %v783_v42, %v255_v39  ;;  %v785_v44 = vpop.f32.mrb[17].mxu1  ;;  %v2761_v39 = vpack.c.bf16 %v887_v38, %v886_v36 }
 0xcaf   :  { %v791_v46 = vadd.f32 %v785_v44, %v257_v41  ;;  %v787_v47 = vpop.f32.mrb[18].mxu1  ;;  %v3636_v44 = vld [vmem:[#allocation7] sm:$0xff]  }
 0xcb0   :  { %v2400_v48 = vmul.f32 -1.442695, %v790_v43  ;;  %v788_v49 = vpop.f32.mrb[19].mxu1  ;;  %2762 = vmatprep.subr.bf16.mxu1 %v2761_v39 }
 0xcb1   :  { %v2401_v58 = vmul.f32 -1.442695, %v791_v46 }
 0xcb2   :  { %2962 = vpow2.f32 %v2400_v48 }
 0xcb3   :  { %2964 = vtanh.f32 %v791_v46  ;;  %v3644_v46 = vld [vmem:[#allocation7 + $0x8] sm:$0xff]  }
 0xcbc   :  { %v2963_v51 = vpop.eup %2962 }
 0xcbd   :  { %v798_v52 = vadd.f32 1.0, %v2963_v51  ;;  %v2965_v53 = vpop.eup %2964 }
 0xcbf   :  { %2966 = vrcp.f32 %v798_v52 }
 0xcc0   :  { %2968 = vpow2.f32 %v2401_v58 }
 0xcc9   :  { %v2967_v63 = vpop.eup %2966 }
 0xcca   :  { %v806_v54 = vmul.f32 %v2967_v63, %v2965_v53  ;;  %v2969_v59 = vpop.eup %2968  ;;  %v805_v0 = vmul.f32 %v2967_v63, %v739_v28 }
 0xccb   :  { %v799_v55 = vadd.f32 1.0, %v2969_v59 }
 0xccc   :  { %808 = vrot.lane.b32.xlu0 %v806_v54, %s3137_s3 }
 0xccd   :  { %2970 = vrcp.f32 %v799_v55 }
 0xcd7   :  { %v2971_v10 = vpop.eup %2970 }
 0xd3e   :  { %v809_v3 = vpop.permute.xlu0 %808 }
 0xd3f   :  { %v811_v5 = vadd.f32 %v809_v3, %v805_v0 }
 0xd41   :  { %2972 = vtanh.f32 %v811_v5 }
 0xd4b   :  { %v2973_v11 = vpop.eup %2972 }
 0xd4c   :  { %v3589_v12 = vmul.f32 %v2973_v11, %v2971_v10 }
 0xd4e   :  { %v814_v14 = vpack.c.bf16 %v3589_v12, %v3589_v12 }
 0xd50   :  { %816 = vrot.lane.b32.xlu1 %v814_v14, %s3137_s3 }
 0xdc2   :  { %v817_v15 = vpop.permute.xlu1 %816 }
 0xdc3   :  { %2402 = vmatmul.mubr.msk.bf16.vlgmr.msra.gmra.mrb[24].mxu0 %vm313_vm0, %v817_v15 }
 0xdc4   :  { %2609 = vmatpush3.bf16.msra.mxu0 %v3636_v44  ;;  %2612 = vmatprep.mubr.msk.bf16.mxu0 %vm3142_vm1, %v3140_v2 }
 0xdc5   :  { %2610 = vmatprep.subr.bf16.mxu0 %v3140_v2 }
 0xdc8   :  { %2611 = vmatpush3.bf16.msra.mxu0 %v3644_v46 }
 0xdc9   :  { %2616 = vmatprep.subr.bf16.mxu0 %v3140_v2 }
 0xe96   :  { %v855_v17 = vpop.f32.mrb[24].mxu0 }
 0xe97   :  { %v862_v25 = vadd.f32 %v855_v17, %v261_v16  ;;  %v857_v18 = vpop.f32.mrb[25].mxu0 }
 0xe98   :  { %v863_v29 = vadd.f32 %v857_v18, %v263_v23  ;;  %v859_v19 = vpop.f32.mrb[26].mxu0 }
 0xe99   :  { %v2403_v32 = vmul.f32 -1.442695, %v862_v25  ;;  %v860_v20 = vpop.f32.mrb[27].mxu0 }
 0xe9a   :  { %v2404_v24 = vmul.f32 -1.442695, %v863_v29 }
 0xe9b   :  { %2974 = vpow2.f32 %v2403_v32 }
 0xe9c   :  { %2976 = vtanh.f32 %v863_v29 }
 0xea5   :  { %v2975_v37 = vpop.eup %2974 }
 0xea6   :  { %v870_v40 = vadd.f32 1.0, %v2975_v37  ;;  %v2977_v45 = vpop.eup %2976 }
 0xea8   :  { %2978 = vrcp.f32 %v870_v40 }
 0xea9   :  { %2980 = vpow2.f32 %v2404_v24 }
 0xeb2   :  { %v2979_v22 = vpop.eup %2978 }
 0xeb3   :  { %v878_v21 = vmul.f32 %v2979_v22, %v2977_v45  ;;  %v2981_v26 = vpop.eup %2980  ;;  %v877_v28 = vmul.f32 %v2979_v22, %v811_v5  ;;  %v2421_v5 = vld [vmem:[%s4041_s5] ss:$0 sm:$0xff] }
 0xeb4   :  { %v871_v27 = vadd.f32 1.0, %v2981_v26 }
 0xeb5   :  { %880 = vrot.lane.b32.xlu0 %v878_v21, %s3137_s3 }
 0xeb6   :  { %2982 = vrcp.f32 %v871_v27 }
 0xeb9   :  { %904 = vrot.lane.b32.xlu0 %v3589_v12, %s3141_s19 }
 0xebd   :  { %908 = vrot.lane.b32.xlu0 %v3558_v13, %s3141_s19 }
 0xec0   :  { %v2983_v41 = vpop.eup %2982 }
 0xec1   :  { %912 = vrot.lane.b32.xlu0 %v3511_v50, %s3141_s19 }
 0xec5   :  { %916 = vrot.lane.b32.xlu0 %v3451_v35, %s3141_s19 }
 0xec9   :  { %1042 = vrot.lane.b32.xlu0 %v3473_v9, %s3137_s3 }
 0xecd   :  { %1046 = vrot.lane.b32.xlu0 %v3541_v33, %s3137_s3 }
 0xed1   :  { %1050 = vrot.lane.b32.xlu0 %v3578_v34, %s3137_s3 }
 0xf27   :  { %v881_v30 = vpop.permute.xlu0 %880 }
 0xf28   :  { %v883_v31 = vadd.f32 %v881_v30, %v877_v28 }
 0xf2a   :  { %2984 = vtanh.f32 %v883_v31 }
 0xf34   :  { %v2985_v42 = vpop.eup %2984 }
 0xf35   :  { %v885_v43 = vmul.f32 %v2985_v42, %v2983_v41 }
 0xf37   :  { %1054 = vrot.lane.b32.xlu0 %v885_v43, %s3137_s3  ;;  %902 = vrot.lane.b32.xlu1 %v885_v43, %s3141_s19 }
 0xf3b   :  { %906 = vrot.lane.b32.xlu1 %v3578_v34, %s3141_s19  ;;  %v888_v34 = vld [vmem:[%s4040_s4 + $0x10] sm:$0xff] }
 0xf3f   :  { %910 = vrot.lane.b32.xlu1 %v3541_v33, %s3141_s19 }
 0xf43   :  { %914 = vrot.lane.b32.xlu1 %v3473_v9, %s3141_s19  ;;  %v905_v9 = vpop.permute.xlu0 %904 }
 0xf47   :  { %1040 = vrot.lane.b32.xlu1 %v3451_v35, %s3137_s3  ;;  %v909_v33 = vpop.permute.xlu0 %908  ;;  %v889_v35 = vld [vmem:[%s4040_s4 + $0x18] sm:$0xff] }
 0xf48   :  { %v2765_v48 = vpack.c.bf16 %v889_v35, %v888_v34 }
 0xf4b   :  { %1044 = vrot.lane.b32.xlu1 %v3511_v50, %s3137_s3  ;;  %v913_v50 = vpop.permute.xlu0 %912 }
 0xf4f   :  { %1048 = vrot.lane.b32.xlu1 %v3558_v13, %s3137_s3  ;;  %v3668_v49 = vpop.permute.xlu0 %916 }
 0xf53   :  { %1052 = vrot.lane.b32.xlu1 %v3589_v12, %s3137_s3  ;;  %v1043_v53 = vpop.permute.xlu0 %1042 }
 0xf57   :  { %v1047_v54 = vpop.permute.xlu0 %1046 }
 0xf5b   :  { %v1051_v55 = vpop.permute.xlu0 %1050 }
 0xfa9   :  { %v903_v47 = vpop.permute.xlu1 %902  ;;  %v3686_v3 = vpop.permute.xlu0 %1054 }
 0xfaa   :  { %2568 = vmatprep.mubr.msk.f32.mxu1 %vm918_vm2, %v903_v47 }
 0xfab   :  { %2569 = vmatmul.mubr.msk.f32.vlgmr.msra.gmra.mrb[20].mxu1 %vm918_vm2, %v905_v9 }
 0xfac   :  { %2764 = vmatpush3.bf16.msra.mxu1 %v2761_v39 }
 0xfad   :  { %v907_v13 = vpop.permute.xlu1 %906  ;;  %2766 = vmatprep.subr.bf16.mxu1 %v2765_v48 }
 0xfae   :  { %2571 = vmatprep.mubr.msk.f32.mxu1 %vm918_vm2, %v907_v13 }
 0xfaf   :  { %2572 = vmatmul.mubr.msk.f32.gmra.mrb[22].mxu1 %vm918_vm2, %v909_v33 }
 0xfb0   :  { %2768 = vmatpush3.bf16.msra.mxu1 %v2765_v48 }
 0xfb1   :  { %v911_v51 = vpop.permute.xlu1 %910  ;;  %2600 = vmatprep.subr.bf16.mxu1 %v3140_v2 }
 0xfb2   :  { %2574 = vmatprep.mubr.msk.f32.mxu1 %vm918_vm2, %v911_v51 }
 0xfb3   :  { %2575 = vmatmul.mubr.msk.f32.gmra.mrb[24].mxu1 %vm918_vm2, %v913_v50 }
 0xfb5   :  { %v915_v52 = vpop.permute.xlu1 %914 }
 0xfb6   :  { %2577 = vmatprep.mubr.msk.f32.mxu1 %vm918_vm2, %v915_v52 }
 0xfb7   :  { %2578 = vmatmul.mubr.msk.f32.gmra.mrb[26].mxu1 %vm918_vm2, %v3668_v49 }
 0xfb9   :  { %v1041_v63 = vpop.permute.xlu1 %1040 }
 0xfba   :  { %2588 = vmatprep.mubr.msk.f32.mxu1 %vm918_vm2, %v1041_v63 }
 0xfbb   :  { %2589 = vmatmul.mubr.msk.f32.vlgmr.msra.gmra.mrb[20].mxu1 %vm918_vm2, %v1043_v53 }
 0xfbc   :  { %2601 = vmatpush3.bf16.msra.mxu1 %v3636_v44 }
 0xfbd   :  { %v1045_v58 = vpop.permute.xlu1 %1044  ;;  %2602 = vmatprep.subr.bf16.mxu1 %v3140_v2 }
 0xfbe   :  { %2591 = vmatprep.mubr.msk.f32.mxu1 %vm918_vm2, %v1045_v58 }
 0xfbf   :  { %2592 = vmatmul.mubr.msk.f32.gmra.mrb[22].mxu1 %vm918_vm2, %v1047_v54 }
 0xfc0   :  { %2603 = vmatpush3.bf16.msra.mxu1 %v3644_v46 }
 0xfc1   :  { %v1049_v59 = vpop.permute.xlu1 %1048  ;;  %2624 = vmatprep.subr.bf16.mxu1 %v3140_v2 }
 0xfc2   :  { %2594 = vmatprep.mubr.msk.f32.mxu1 %vm918_vm2, %v1049_v59 }
 0xfc3   :  { %2595 = vmatmul.mubr.msk.f32.gmra.mrb[24].mxu1 %vm918_vm2, %v1051_v55 }
 0xfc5   :  { %v1053_v0 = vpop.permute.xlu1 %1052 }
 0xfc6   :  { %2597 = vmatprep.mubr.msk.f32.mxu1 %vm918_vm2, %v1053_v0 }
 0xfc7   :  { %2598 = vmatmul.mubr.msk.f32.gmra.mrb[26].mxu1 %vm918_vm2, %v3686_v3 }
 0xfc8   :  { %2604 = vmatprep.mubr.msk.bf16.mxu1 %vm3142_vm1, %v3140_v2 }
 0xfcb   :  { %2605 = vmatmul.mubr.bf16.vlgmr.msra.gmra.mrb[28].mxu1 %v3139_v1 }
 0xfcc   :  { %2625 = vmatpush3.bf16.msra.mxu1 %v3636_v44  ;;  %2628 = vmatprep.mubr.msk.bf16.mxu1 %vm3142_vm1, %v3140_v2 }
 0xfcd   :  { %2626 = vmatprep.subr.bf16.mxu1 %v3140_v2 }
 0xfd0   :  { %2627 = vmatpush3.bf16.msra.mxu1 %v3644_v46 }
 0xfd1   :  { %2640 = vmatprep.subr.bf16.mxu1 %v3140_v2 }
0x108e   :  { %v2590_v10 = vpop.f32.mrb[20].mxu1 }
0x108f   :  { %v1185_v11 = vadd.f32 %v2590_v10, %v2421_v5  ;;  %v1138_v12 = vpop.f32.mrb[21].mxu1 }
0x1090   :  { %v1184_v37 = vadd.f32 %v2421_v5, %v1138_v12 }
0x1092   :  { %v2593_v14 = vpop.f32.mrb[22].mxu1 }
0x1093   :  { %v3703_v1 = vadd.f32 %v2593_v14, %v2421_v5  ;;  %v1148_v15 = vpop.f32.mrb[23].mxu1 }
0x1094   :  { %v3705_v16 = vadd.f32 %v2421_v5, %v1148_v15 }
0x1096   :  { %v2596_v23 = vpop.f32.mrb[24].mxu1 }
0x1097   :  { %v3707_v17 = vadd.f32 %v2596_v23, %v2421_v5  ;;  %v1158_v25 = vpop.f32.mrb[25].mxu1 }
0x1098   :  { %v3709_v18 = vadd.f32 %v2421_v5, %v1158_v25 }
0x109a   :  { %v2599_v29 = vpop.f32.mrb[26].mxu1 }
0x109b   :  { %v3711_v19 = vadd.f32 %v2599_v29, %v2421_v5  ;;  %v1168_v32 = vpop.f32.mrb[27].mxu1 }
0x109c   :  { %v3713_v20 = vadd.f32 %v2421_v5, %v1168_v32 }
0x109e   :  { %v1244_v40 = vpop.f32.mrb[28].mxu1 }
0x109f   :  { %v1250_v45 = vadd.f32 %v1244_v40, %v1184_v37  ;;  %v2606_v22 = vpop.f32.mrb[29].mxu1 }
0x10a0   :  { %v1247_v21 = vpop.f32.mrb[30].mxu1 }
0x10a1   :  { %2986 = vtanh.f32 %v1250_v45  ;;  %v2607_v7 = vpop.f32.mrb[31].mxu1  ;;  %v2424_v60 = vmul.f32 -1.442695, %v1250_v45 }
0x10a3   :  { %2988 = vpow2.f32 %v2424_v60 }
0x10ab   :  { %v2987_v8 = vpop.eup %2986 }
0x10ac   :  { %1260 = vrot.lane.b32.xlu1 %v2987_v8, %s3137_s3 }
0x10ad   :  { %v2989_v61 = vpop.eup %2988 }
0x10ae   :  { %v1254_v56 = vadd.f32 1.0, %v2989_v61 }
0x10b0   :  { %2990 = vrcp.f32 %v1254_v56 }
0x10ba   :  { %v2991_v57 = vpop.eup %2990 }
0x10bb   :  { %v1258_v27 = vmul.f32 0.0, %v2991_v57 }
0x111e   :  { %v1261_v24 = vpop.permute.xlu1 %1260 }
0x111f   :  { %v1263_v26 = vmul.f32 %v2991_v57, %v1261_v24 }
0x1121   :  { %1265 = vrot.lane.b32.xlu0 %v1263_v26, %s3141_s19 }
0x1193   :  { %v1266_v28 = vpop.permute.xlu0 %1265 }
0x1194   :  { %v1268_v30 = vadd.f32 %v1266_v28, %v1258_v27 }
0x1196   :  { %2992 = vtanh.f32 %v1268_v30 }
0x11a0   :  { %v2993_v31 = vpop.eup %2992 }
0x11a1   :  { %1271 = vrot.lane.b32.xlu1 %v2993_v31, %s3137_s3 }
0x1213   :  { %v1272_v36 = vpop.permute.xlu1 %1271 }
0x1214   :  { %v1274_v38 = vmul.f32 %v2991_v57, %v1272_v36 }
0x1216   :  { %v1275_v39 = vpack.c.bf16 %v1274_v38, %v1274_v38 }
0x1218   :  { %1277 = vrot.lane.b32.xlu0 %v1275_v39, %s3141_s19 }
0x128a   :  { %v1278_v41 = vpop.permute.xlu0 %1277 }
0x128b   :  { %2613 = vmatmul.mubr.msk.bf16.vlgmr.msra.gmra.mrb[28].mxu0 %vm918_vm2, %v1278_v41 }
0x128c   :  { %2617 = vmatpush3.bf16.msra.mxu0 %v3636_v44  ;;  %2620 = vmatprep.mubr.msk.bf16.mxu0 %vm3142_vm1, %v3140_v2 }
0x128d   :  { %2618 = vmatprep.subr.bf16.mxu0 %v3140_v2 }
0x1290   :  { %2619 = vmatpush3.bf16.msra.mxu0 %v3644_v46 }
0x1291   :  { %2632 = vmatprep.subr.bf16.mxu0 %v3140_v2 }
0x135e   :  { %v1316_v42 = vpop.f32.mrb[28].mxu0 }
0x135f   :  { %v1322_v43 = vadd.f32 %v1316_v42, %v1185_v11  ;;  %v2614_v9 = vpop.f32.mrb[29].mxu0 }
0x1360   :  { %v1319_v33 = vpop.f32.mrb[30].mxu0 }
0x1361   :  { %2994 = vtanh.f32 %v1322_v43  ;;  %v2615_v34 = vpop.f32.mrb[31].mxu0  ;;  %v2426_v47 = vmul.f32 -1.442695, %v1322_v43 }
0x1363   :  { %2996 = vpow2.f32 %v2426_v47 }
0x136b   :  { %v2995_v35 = vpop.eup %2994 }
0x136c   :  { %1332 = vrot.lane.b32.xlu1 %v2995_v35, %s3137_s3 }
0x136d   :  { %v2997_v48 = vpop.eup %2996 }
0x136e   :  { %v1326_v50 = vadd.f32 1.0, %v2997_v48 }
0x1370   :  { %2998 = vrcp.f32 %v1326_v50 }
0x137a   :  { %v2999_v13 = vpop.eup %2998 }
0x137b   :  { %v1330_v53 = vmul.f32 %v2999_v13, %v1268_v30 }
0x13de   :  { %v1333_v51 = vpop.permute.xlu1 %1332 }
0x13df   :  { %v1335_v52 = vmul.f32 %v2999_v13, %v1333_v51 }
0x13e1   :  { %1337 = vrot.lane.b32.xlu0 %v1335_v52, %s3141_s19 }
0x1453   :  { %v1338_v63 = vpop.permute.xlu0 %1337 }
0x1454   :  { %v1340_v54 = vadd.f32 %v1338_v63, %v1330_v53 }
0x1456   :  { %3000 = vtanh.f32 %v1340_v54 }
0x1460   :  { %v3001_v58 = vpop.eup %3000 }
0x1461   :  { %1343 = vrot.lane.b32.xlu1 %v3001_v58, %s3137_s3 }
0x14d3   :  { %v1344_v59 = vpop.permute.xlu1 %1343 }
0x14d4   :  { %v1346_v55 = vmul.f32 %v2999_v13, %v1344_v59 }
0x14d6   :  { %v1347_v0 = vpack.c.bf16 %v1346_v55, %v1346_v55 }
0x14d8   :  { %1349 = vrot.lane.b32.xlu0 %v1347_v0, %s3141_s19 }
0x154a   :  { %v1350_v5 = vpop.permute.xlu0 %1349 }
0x154b   :  { %2621 = vmatmul.mubr.msk.bf16.vlgmr.msra.gmra.mrb[32].mxu0 %vm918_vm2, %v1350_v5 }
0x154c   :  { %2633 = vmatpush3.bf16.msra.mxu0 %v3636_v44  ;;  %2636 = vmatprep.mubr.msk.bf16.mxu0 %vm3142_vm1, %v3140_v2 }
0x154d   :  { %2634 = vmatprep.subr.bf16.mxu0 %v3140_v2 }
0x1550   :  { %2635 = vmatpush3.bf16.msra.mxu0 %v3644_v46 }
0x1551   :  { %2648 = vmatprep.subr.bf16.mxu0 %v3140_v2 }
0x161e   :  { %v1388_v10 = vpop.f32.mrb[32].mxu0 }
0x161f   :  { %v1394_v11 = vadd.f32 %v1388_v10, %v3705_v16  ;;  %v2622_v12 = vpop.f32.mrb[33].mxu0 }
0x1620   :  { %v1391_v14 = vpop.f32.mrb[34].mxu0 }
0x1621   :  { %3002 = vtanh.f32 %v1394_v11  ;;  %v2623_v15 = vpop.f32.mrb[35].mxu0  ;;  %v2428_v25 = vmul.f32 -1.442695, %v1394_v11 }
0x1623   :  { %3004 = vpow2.f32 %v2428_v25 }
0x162b   :  { %v3003_v23 = vpop.eup %3002 }
0x162c   :  { %1404 = vrot.lane.b32.xlu1 %v3003_v23, %s3137_s3 }
0x162d   :  { %v3005_v29 = vpop.eup %3004 }
0x162e   :  { %v1398_v32 = vadd.f32 1.0, %v3005_v29 }
0x1630   :  { %3006 = vrcp.f32 %v1398_v32 }
0x163a   :  { %v3007_v37 = vpop.eup %3006 }
0x163b   :  { %v1402_v22 = vmul.f32 %v3007_v37, %v1340_v54 }
0x169e   :  { %v1405_v40 = vpop.permute.xlu1 %1404 }
0x169f   :  { %v1407_v45 = vmul.f32 %v3007_v37, %v1405_v40 }
0x16a1   :  { %1409 = vrot.lane.b32.xlu0 %v1407_v45, %s3141_s19 }
0x1713   :  { %v1410_v21 = vpop.permute.xlu0 %1409 }
0x1714   :  { %v1412_v16 = vadd.f32 %v1410_v21, %v1402_v22 }
0x1716   :  { %3008 = vtanh.f32 %v1412_v16 }
0x1720   :  { %v3009_v7 = vpop.eup %3008 }
0x1721   :  { %1415 = vrot.lane.b32.xlu1 %v3009_v7, %s3137_s3 }
0x1793   :  { %v1416_v8 = vpop.permute.xlu1 %1415 }
0x1794   :  { %v1418_v60 = vmul.f32 %v3007_v37, %v1416_v8 }
0x1796   :  { %v1419_v61 = vpack.c.bf16 %v1418_v60, %v1418_v60 }
0x1798   :  { %1421 = vrot.lane.b32.xlu0 %v1419_v61, %s3141_s19 }
0x180a   :  { %v1422_v56 = vpop.permute.xlu0 %1421 }
0x180b   :  { %2629 = vmatmul.mubr.msk.bf16.vlgmr.msra.gmra.mrb[32].mxu1 %vm918_vm2, %v1422_v56 }
0x180c   :  { %2641 = vmatpush3.bf16.msra.mxu1 %v3636_v44  ;;  %2644 = vmatprep.mubr.msk.bf16.mxu1 %vm3142_vm1, %v3140_v2 }
0x180d   :  { %2642 = vmatprep.subr.bf16.mxu1 %v3140_v2 }
0x1810   :  { %2643 = vmatpush3.bf16.msra.mxu1 %v3644_v46 }
0x1811   :  { %2656 = vmatprep.subr.bf16.mxu1 %v3140_v2 }
0x18de   :  { %v1460_v57 = vpop.f32.mrb[32].mxu1 }
0x18df   :  { %v1466_v24 = vadd.f32 %v1460_v57, %v3703_v1  ;;  %v2630_v26 = vpop.f32.mrb[33].mxu1  ;;  %v3143_v57 = vmov 0.0|0.0  }
0x18e0   :  { %v1463_v27 = vpop.f32.mrb[34].mxu1 }
0x18e1   :  { %3010 = vtanh.f32 %v1466_v24  ;;  %v2631_v28 = vpop.f32.mrb[35].mxu1  ;;  %v2430_v31 = vmul.f32 -1.442695, %v1466_v24 }
0x18e2   :  { %v1783_v28 = vld [vmem:[#allocation5 + $0x20] sm:$0xff] }
0x18e3   :  { %3012 = vpow2.f32 %v2430_v31 }
0x18eb   :  { %v3011_v30 = vpop.eup %3010 }
0x18ec   :  { %1476 = vrot.lane.b32.xlu1 %v3011_v30, %s3137_s3  ;;  %v1784_v30 = vld [vmem:[#allocation5 + $0x28] sm:$0xff] }
0x18ed   :  { %v3013_v36 = vpop.eup %3012  ;;  %v2770_v31 = vpack.c.bf16 %v1784_v30, %v1783_v28 }
0x18ee   :  { %v1470_v38 = vadd.f32 1.0, %v3013_v36  ;;  %v1785_v36 = vld [vmem:[#allocation5 + $0x30] sm:$0xff] }
0x18f0   :  { %3014 = vrcp.f32 %v1470_v38  ;;  %v1786_v38 = vld [vmem:[#allocation5 + $0x38] sm:$0xff] }
0x18fa   :  { %v3015_v39 = vpop.eup %3014 }
0x18fb   :  { %v1474_v43 = vmul.f32 %v3015_v39, %v1412_v16 }
0x195e   :  { %v1477_v41 = vpop.permute.xlu1 %1476 }
0x195f   :  { %v1479_v42 = vmul.f32 %v3015_v39, %v1477_v41  ;;  %v2773_v41 = vpack.c.bf16 %v1786_v38, %v1785_v36  ;;  %v1962_v36 = vld [vmem:[%s4045_s9 + $0x48] sm:$0xff]  ;;  %v1964_v38 = vld [vmem:[%s4045_s9 + $0x58] sm:$0xff] }
0x1961   :  { %1481 = vrot.lane.b32.xlu0 %v1479_v42, %s3141_s19 }
0x19d3   :  { %v1482_v9 = vpop.permute.xlu0 %1481 }
0x19d4   :  { %v1484_v1 = vadd.f32 %v1482_v9, %v1474_v43 }
0x19d6   :  { %3016 = vtanh.f32 %v1484_v1 }
0x19e0   :  { %v3017_v33 = vpop.eup %3016 }
0x19e1   :  { %1487 = vrot.lane.b32.xlu1 %v3017_v33, %s3137_s3 }
0x1a53   :  { %v1488_v34 = vpop.permute.xlu1 %1487 }
0x1a54   :  { %v1490_v35 = vmul.f32 %v3015_v39, %v1488_v34 }
0x1a56   :  { %v1491_v47 = vpack.c.bf16 %v1490_v35, %v1490_v35 }
0x1a58   :  { %1493 = vrot.lane.b32.xlu0 %v1491_v47, %s3141_s19 }
0x1aca   :  { %v1494_v48 = vpop.permute.xlu0 %1493 }
0x1acb   :  { %2637 = vmatmul.mubr.msk.bf16.vlgmr.msra.gmra.mrb[36].mxu0 %vm918_vm2, %v1494_v48 }
0x1acc   :  { %2649 = vmatpush3.bf16.msra.mxu0 %v3636_v44  ;;  %2652 = vmatprep.mubr.msk.bf16.mxu0 %vm3142_vm1, %v3140_v2 }
0x1acd   :  { %2650 = vmatprep.subr.bf16.mxu0 %v3140_v2 }
0x1ad0   :  { %2651 = vmatpush3.bf16.msra.mxu0 %v3644_v46 }
0x1ad1   :  { %2769 = vmatprep.subr.bf16.mxu0 %v3143_v57 }
0x1b9e   :  { %v1532_v50 = vpop.f32.mrb[36].mxu0 }
0x1b9f   :  { %v1538_v13 = vadd.f32 %v1532_v50, %v3709_v18  ;;  %v2638_v51 = vpop.f32.mrb[37].mxu0 }
0x1ba0   :  { %v1535_v52 = vpop.f32.mrb[38].mxu0 }
0x1ba1   :  { %3018 = vtanh.f32 %v1538_v13  ;;  %v2639_v53 = vpop.f32.mrb[39].mxu0  ;;  %v2432_v54 = vmul.f32 -1.442695, %v1538_v13 }
0x1ba3   :  { %3020 = vpow2.f32 %v2432_v54 }
0x1bab   :  { %v3019_v63 = vpop.eup %3018 }
0x1bac   :  { %1548 = vrot.lane.b32.xlu1 %v3019_v63, %s3137_s3 }
0x1bad   :  { %v3021_v58 = vpop.eup %3020 }
0x1bae   :  { %v1542_v59 = vadd.f32 1.0, %v3021_v58 }
0x1bb0   :  { %3022 = vrcp.f32 %v1542_v59 }
0x1bba   :  { %v3023_v55 = vpop.eup %3022 }
0x1bbb   :  { %v1546_v10 = vmul.f32 %v3023_v55, %v1484_v1 }
0x1c1e   :  { %v1549_v0 = vpop.permute.xlu1 %1548 }
0x1c1f   :  { %v1551_v5 = vmul.f32 %v3023_v55, %v1549_v0  ;;  %v1779_v0 = vld [vmem:[#allocation5] sm:$0xff] }
0x1c21   :  { %1553 = vrot.lane.b32.xlu0 %v1551_v5, %s3141_s19  ;;  %v1780_v5 = vld [vmem:[#allocation5 + $0x8] sm:$0xff] }
0x1c93   :  { %v1554_v11 = vpop.permute.xlu0 %1553 }
0x1c94   :  { %v1556_v18 = vadd.f32 %v1554_v11, %v1546_v10  ;;  %v2776_v10 = vpack.c.bf16 %v1780_v5, %v1779_v0  ;;  %v1781_v11 = vld [vmem:[#allocation5 + $0x10] sm:$0xff] }
0x1c95   :  { %v2156_v0 = vld [vmem:[%s4047_s11 + $0x98] sm:$0xff] }
0x1c96   :  { %3024 = vtanh.f32 %v1556_v18 }
0x1ca0   :  { %v3025_v12 = vpop.eup %3024 }
0x1ca1   :  { %1559 = vrot.lane.b32.xlu1 %v3025_v12, %s3137_s3 }
0x1d13   :  { %v1560_v14 = vpop.permute.xlu1 %1559 }
0x1d14   :  { %v1562_v15 = vmul.f32 %v3023_v55, %v1560_v14 }
0x1d16   :  { %v1563_v23 = vpack.c.bf16 %v1562_v15, %v1562_v15 }
0x1d18   :  { %1565 = vrot.lane.b32.xlu0 %v1563_v23, %s3141_s19 }
0x1d8a   :  { %v1566_v25 = vpop.permute.xlu0 %1565 }
0x1d8b   :  { %2645 = vmatmul.mubr.msk.bf16.vlgmr.msra.gmra.mrb[36].mxu1 %vm918_vm2, %v1566_v25 }
0x1d8c   :  { %2657 = vmatpush3.bf16.msra.mxu1 %v3636_v44  ;;  %2660 = vmatprep.mubr.msk.bf16.mxu1 %vm3142_vm1, %v3140_v2 }
0x1d8d   :  { %2658 = vmatprep.subr.bf16.mxu1 %v3140_v2 }
0x1d90   :  { %2659 = vmatpush3.bf16.msra.mxu1 %v3644_v46 }
0x1d91   :  { %2775 = vmatprep.subr.bf16.mxu1 %v3143_v57 }
0x1e5e   :  { %v1604_v29 = vpop.f32.mrb[36].mxu1 }
0x1e5f   :  { %v1610_v32 = vadd.f32 %v1604_v29, %v3707_v17  ;;  %v2646_v37 = vpop.f32.mrb[37].mxu1 }
0x1e60   :  { %v1607_v40 = vpop.f32.mrb[38].mxu1 }
0x1e61   :  { %3026 = vtanh.f32 %v1610_v32  ;;  %v2647_v45 = vpop.f32.mrb[39].mxu1  ;;  %v2434_v21 = vmul.f32 -1.442695, %v1610_v32  ;;  %v2441_v40 = vld [vmem:[%s4043_s7] ss:$0 sm:$0xff]  ;;  %s3144_s7 = smov 96  }
0x1e63   :  { %3028 = vpow2.f32 %v2434_v21 }
0x1e6b   :  { %v3027_v22 = vpop.eup %3026 }
0x1e6c   :  { %1620 = vrot.lane.b32.xlu1 %v3027_v22, %s3137_s3 }
0x1e6d   :  { %v3029_v44 = vpop.eup %3028 }
0x1e6e   :  { %v1614_v16 = vadd.f32 1.0, %v3029_v44 }
0x1e70   :  { %3030 = vrcp.f32 %v1614_v16 }
0x1e7a   :  { %v3031_v7 = vpop.eup %3030 }
0x1e7b   :  { %v1618_v46 = vmul.f32 %v3031_v7, %v1556_v18  ;;  %v1782_v18 = vld [vmem:[#allocation5 + $0x18] sm:$0xff] }
0x1e7c   :  { %v2779_v14 = vpack.c.bf16 %v1782_v18, %v1781_v11  ;;  %v2139_v11 = vld [vmem:[%s4047_s11 + $0x10] sm:$0xff]  ;;  %v2140_v18 = vld [vmem:[%s4047_s11 + $0x18] sm:$0xff] }
0x1ede   :  { %v1621_v8 = vpop.permute.xlu1 %1620 }
0x1edf   :  { %v1623_v60 = vmul.f32 %v3031_v7, %v1621_v8 }
0x1ee1   :  { %1625 = vrot.lane.b32.xlu0 %v1623_v60, %s3141_s19 }
0x1f53   :  { %v1626_v61 = vpop.permute.xlu0 %1625 }
0x1f54   :  { %v1628_v17 = vadd.f32 %v1626_v61, %v1618_v46 }
0x1f56   :  { %3032 = vtanh.f32 %v1628_v17 }
0x1f60   :  { %v3033_v56 = vpop.eup %3032 }
0x1f61   :  { %1631 = vrot.lane.b32.xlu1 %v3033_v56, %s3137_s3 }
0x1fd3   :  { %v1632_v24 = vpop.permute.xlu1 %1631 }
0x1fd4   :  { %v1634_v26 = vmul.f32 %v3031_v7, %v1632_v24 }
0x1fd6   :  { %v1635_v27 = vpack.c.bf16 %v1634_v26, %v1634_v26 }
0x1fd8   :  { %1637 = vrot.lane.b32.xlu0 %v1635_v27, %s3141_s19 }
0x204a   :  { %v1638_v39 = vpop.permute.xlu0 %1637 }
0x204b   :  { %2653 = vmatmul.mubr.msk.bf16.vlgmr.msra.gmra.mrb[40].mxu0 %vm918_vm2, %v1638_v39 }
0x204c   :  { %2771 = vmatpush3.bf16.msra.mxu0 %v2770_v31  ;;  %2672 = vmatprep.mubr.msk.f32.mxu0 %vm3142_vm1, %v3140_v2 }
0x204d   :  { %2772 = vmatprep.subr.bf16.mxu0 %v3143_v57 }
0x2050   :  { %2774 = vmatpush3.bf16.msra.mxu0 %v2773_v41  ;;  %v2781_v41 = vpack.c.bf16 %v1964_v38, %v1962_v36  ;;  %v2148_v36 = vld [vmem:[%s4047_s11 + $0x58] sm:$0xff] }
0x2052   :  { %2782 = vmatprep.subr.bf16.mxu0 %v2781_v41  ;;  %v2166_v41 = vld [vmem:[%s4047_s11 + $0xe8] sm:$0xff] }
0x2053   :  { %2673 = vmatmul.mubr.msk.f32.vlgmr.msra.gmra.mrb[44].mxu0 %vm918_vm2, %v3668_v49 }
0x2054   :  { %2038 = vmatprep.mubr.f32.mxu0 %v3140_v2 }
0x211e   :  { %v1676_v42 = vpop.f32.mrb[40].mxu0 }
0x211f   :  { %v1682_v43 = vadd.f32 %v1676_v42, %v3713_v20  ;;  %v2654_v9 = vpop.f32.mrb[41].mxu0  ;;  %v1961_v42 = vld [vmem:[%s4045_s9 + $0x40] sm:$0xff] }
0x2120   :  { %v1679_v1 = vpop.f32.mrb[42].mxu0 }
0x2121   :  { %3034 = vtanh.f32 %v1682_v43  ;;  %v2655_v33 = vpop.f32.mrb[43].mxu0  ;;  %v2436_v48 = vmul.f32 -1.442695, %v1682_v43  ;;  %v1963_v43 = vld [vmem:[%s4045_s9 + $0x50] sm:$0xff]  ;;  %v1966_v1 = vld [vmem:[%s4045_s9 + $0x68] sm:$0xff] }
0x2122   :  { %v2783_v9 = vpack.c.bf16 %v1963_v43, %v1961_v42  ;;  %v1968_v33 = vld [vmem:[%s4045_s9 + $0x78] sm:$0xff]  ;;  %v1957_v43 = vld [vmem:[%s4045_s9 + $0x20] sm:$0xff] }
0x2123   :  { %3036 = vpow2.f32 %v2436_v48 }
0x2124   :  { %2784 = vmatpush1.bf16.msra.mxu0 %v2783_v9  ;;  %v1959_v9 = vld [vmem:[%s4045_s9 + $0x30] sm:$0xff] }
0x2126   :  { %v1853_v34 = vpop.f32.mrb[44].mxu0 }
0x2127   :  { %v2674_v35 = vpop.f32.mrb[45].mxu0 }
0x2128   :  { %v2785_v35 = vpack.c.bf16 %v1968_v33, %v1966_v1 }
0x212a   :  { %2786 = vmatprep.subr.bf16.mxu0 %v2785_v35  ;;  %v2795_v35 = vpack.c.bf16 %v1959_v9, %v1957_v43 }
0x212b   :  { %v3035_v47 = vpop.eup %3034 }
0x212c   :  { %1692 = vrot.lane.b32.xlu1 %v3035_v47, %s3137_s3  ;;  %v1967_v47 = vld [vmem:[%s4045_s9 + $0x70] sm:$0xff] }
0x212d   :  { %v3037_v50 = vpop.eup %3036 }
0x212e   :  { %v1686_v13 = vadd.f32 1.0, %v3037_v50  ;;  %v1954_v50 = vld [vmem:[%s4045_s9 + $0x8] sm:$0xff] }
0x2130   :  { %3038 = vrcp.f32 %v1686_v13  ;;  %v1956_v13 = vld [vmem:[%s4045_s9 + $0x18] sm:$0xff] }
0x213a   :  { %v3039_v49 = vpop.eup %3038 }
0x213b   :  { %v1690_v20 = vmul.f32 %v3039_v49, %v1628_v17 }
0x219e   :  { %v1693_v51 = vpop.permute.xlu1 %1692 }
0x219f   :  { %v1695_v52 = vmul.f32 %v3039_v49, %v1693_v51 }
0x21a1   :  { %1697 = vrot.lane.b32.xlu0 %v1695_v52, %s3141_s19 }
0x2213   :  { %v1698_v53 = vpop.permute.xlu0 %1697 }
0x2214   :  { %v1700_v63 = vadd.f32 %v1698_v53, %v1690_v20  ;;  %v2153_v53 = vld [vmem:[%s4047_s11 + $0x80] sm:$0xff] }
0x2216   :  { %3040 = vtanh.f32 %v1700_v63 }
0x2220   :  { %v3041_v54 = vpop.eup %3040 }
0x2221   :  { %1703 = vrot.lane.b32.xlu1 %v3041_v54, %s3137_s3  ;;  %v2137_v54 = vld [vmem:[%s4047_s11] sm:$0xff] }
0x2293   :  { %v1704_v58 = vpop.permute.xlu1 %1703 }
0x2294   :  { %v1706_v59 = vmul.f32 %v3039_v49, %v1704_v58  ;;  %v2789_v49 = vpack.c.bf16 %v1956_v13, %v1954_v50  ;;  %v2150_v50 = vld [vmem:[%s4047_s11 + $0x68] sm:$0xff] }
0x2296   :  { %v1707_v55 = vpack.c.bf16 %v1706_v59, %v1706_v59  ;;  %v2138_v59 = vld [vmem:[%s4047_s11 + $0x8] sm:$0xff] }
0x2297   :  { %v2799_v5 = vpack.c.bf16 %v2138_v59, %v2137_v54  ;;  %v2248_v54 = vld [vmem:[%s4049_s13 + $0x8] sm:$0xff] }
0x2298   :  { %1709 = vrot.lane.b32.xlu0 %v1707_v55, %s3141_s19  ;;  %v2155_v55 = vld [vmem:[%s4047_s11 + $0x90] sm:$0xff] }
0x230a   :  { %v1710_v12 = vpop.permute.xlu0 %1709 }
0x230b   :  { %2661 = vmatmul.mubr.msk.bf16.vlgmr.msra.gmra.mrb[40].mxu1 %vm918_vm2, %v1710_v12  ;;  %v2157_v12 = vld [vmem:[%s4047_s11 + $0xa0] sm:$0xff] }
0x230c   :  { %2777 = vmatpush3.bf16.msra.mxu1 %v2776_v10  ;;  %2683 = vmatprep.mubr.msk.f32.mxu1 %vm3142_vm1, %v3140_v2  ;;  %v2801_v10 = vpack.c.bf16 %v2156_v0, %v2155_v55  ;;  %v2250_v55 = vld [vmem:[%s4049_s13 + $0x18] sm:$0xff] }
0x230d   :  { %2778 = vmatprep.subr.bf16.mxu1 %v3143_v57 }
0x2310   :  { %2780 = vmatpush3.bf16.msra.mxu1 %v2779_v14  ;;  %v2158_v14 = vld [vmem:[%s4047_s11 + $0xa8] sm:$0xff] }
0x2313   :  { %2684 = vmatmul.mubr.msk.f32.vlgmr.msra.gmra.mrb[44].mxu1 %vm918_vm2, %v3686_v3 }
0x23de   :  { %v1748_v15 = vpop.f32.mrb[40].mxu1 }
0x23df   :  { %v1754_v23 = vadd.f32 %v1748_v15, %v3711_v19  ;;  %v2662_v25 = vpop.f32.mrb[41].mxu1  ;;  %v2803_v15 = vpack.c.bf16 %v2140_v18, %v2139_v11  ;;  %v2253_v18 = vld [vmem:[%s4049_s13 + $0x30] sm:$0xff] }
0x23e0   :  { %v1751_v29 = vpop.f32.mrb[42].mxu1  ;;  %v2141_v25 = vld [vmem:[%s4047_s11 + $0x20] sm:$0xff] }
0x23e1   :  { %3042 = vtanh.f32 %v1754_v23  ;;  %v2663_v32 = vpop.f32.mrb[43].mxu1  ;;  %v2438_v19 = vmul.f32 -1.442695, %v1754_v23  ;;  %v2805_v23 = vpack.c.bf16 %v2158_v14, %v2157_v12  ;;  %v2142_v29 = vld [vmem:[%s4047_s11 + $0x28] sm:$0xff]  ;;  %v2254_v12 = vld [vmem:[%s4049_s13 + $0x38] sm:$0xff] }
0x23e2   :  { %v2159_v32 = vld [vmem:[%s4047_s11 + $0xb0] sm:$0xff]  ;;  %v2839_v14 = vpack.c.bf16 %v2254_v12, %v2253_v18 }
0x23e6   :  { %v1923_v37 = vpop.f32.mrb[44].mxu1 }
0x23e7   :  { %v1924_v45 = vadd.f32 %v1923_v37, %v1853_v34  ;;  %v2685_v22 = vpop.f32.mrb[45].mxu1  ;;  %v1965_v34 = vld [vmem:[%s4045_s9 + $0x60] sm:$0xff]  ;;  %v2160_v37 = vld [vmem:[%s4047_s11 + $0xb8] sm:$0xff] }
0x23e8   :  { %v2787_v48 = vpack.c.bf16 %v1967_v47, %v1965_v34  ;;  %v2143_v22 = vld [vmem:[%s4047_s11 + $0x30] sm:$0xff] }
0x23e9   :  { %v1934_v21 = vadd.f32 %v2441_v40, %v1924_v45  ;;  %v2807_v40 = vpack.c.bf16 %v2142_v29, %v2141_v25  ;;  %v2809_v45 = vpack.c.bf16 %v2160_v37, %v2159_v32  ;;  %v2257_v29 = vld [vmem:[%s4049_s13 + $0x50] sm:$0xff]  ;;  %v2258_v32 = vld [vmem:[%s4049_s13 + $0x58] sm:$0xff] }
0x23ea   :  { %2788 = vmatpush1.bf16.msra.mxu0 %v2787_v48  ;;  %v2149_v48 = vld [vmem:[%s4047_s11 + $0x60] sm:$0xff]  ;;  %v2845_v37 = vpack.c.bf16 %v2258_v32, %v2257_v29 }
0x23eb   :  { %v3043_v44 = vpop.eup %3042  ;;  %3044 = vtanh.f32 %v1934_v21  ;;  %v2442_v16 = vmul.f32 -1.442695, %v1934_v21  ;;  %2790 = vmatprep.subr.bf16.mxu0 %v2789_v49  ;;  %v2144_v21 = vld [vmem:[%s4047_s11 + $0x38] sm:$0xff]  ;;  %v2823_v13 = vpack.c.bf16 %v2150_v50, %v2149_v48  ;;  %v2167_v49 = vld [vmem:[%s4047_s11 + $0xf0] sm:$0xff] }
0x23ec   :  { %1764 = vrot.lane.b32.xlu1 %v3043_v44, %s3137_s3  ;;  %3046 = vpow2.f32 %v2438_v19  ;;  %v2162_v19 = vld [vmem:[%s4047_s11 + $0xc8] sm:$0xff] }
0x23ed   :  { %3048 = vpow2.f32 %v2442_v16 }
0x23f5   :  { %v3045_v3 = vpop.eup %3044 }
0x23f6   :  { %1943 = vrot.lane.b32.xlu0 %v3045_v3, %s3137_s3  ;;  %v3047_v7 = vpop.eup %3046  ;;  %v2161_v3 = vld [vmem:[%s4047_s11 + $0xc0] sm:$0xff] }
0x23f7   :  { %v1758_v8 = vadd.f32 1.0, %v3047_v7  ;;  %v3049_v60 = vpop.eup %3048  ;;  %v2811_v7 = vpack.c.bf16 %v2144_v21, %v2143_v22 }
0x23f8   :  { %v1938_v46 = vadd.f32 1.0, %v3049_v60  ;;  %v2145_v60 = vld [vmem:[%s4047_s11 + $0x40] sm:$0xff] }
0x23f9   :  { %3050 = vrcp.f32 %v1758_v8  ;;  %v2813_v8 = vpack.c.bf16 %v2162_v19, %v2161_v3 }
0x23fa   :  { %3052 = vrcp.f32 %v1938_v46  ;;  %v2146_v46 = vld [vmem:[%s4047_s11 + $0x48] sm:$0xff] }
0x2403   :  { %v3802_v61 = vpop.eup %3050 }
0x2404   :  { %v3053_v24 = vpop.eup %3052  ;;  %v1762_v30 = vmul.f32 %v3802_v61, %v1700_v63  ;;  %v2154_v63 = vld [vmem:[%s4047_s11 + $0x88] sm:$0xff] }
0x2405   :  { %v2797_v58 = vpack.c.bf16 %v2154_v63, %v2153_v53  ;;  %v2247_v63 = vld [vmem:[%s4049_s13] sm:$0xff] }
0x2406   :  { %v2830_v59 = vpack.c.bf16 %v2248_v54, %v2247_v63 }
0x2407   :  { %2798 = vmatprep.subr.bf16.mxu1 %v2797_v58  ;;  %v2249_v58 = vld [vmem:[%s4049_s13 + $0x10] sm:$0xff] }
0x2408   :  { %2800 = vmatpush3.bf16.msra.mxu1 %v2799_v5  ;;  %v2833_v0 = vpack.c.bf16 %v2250_v55, %v2249_v58  ;;  %v2251_v5 = vld [vmem:[%s4049_s13 + $0x20] sm:$0xff] }
0x2409   :  { %2802 = vmatprep.subr.bf16.mxu1 %v2801_v10  ;;  %v2252_v10 = vld [vmem:[%s4049_s13 + $0x28] sm:$0xff] }
0x240a   :  { %v2836_v11 = vpack.c.bf16 %v2252_v10, %v2251_v5 }
0x240c   :  { %2804 = vmatpush3.bf16.msra.mxu1 %v2803_v15  ;;  %v2255_v15 = vld [vmem:[%s4049_s13 + $0x40] sm:$0xff] }
0x240d   :  { %2806 = vmatprep.subr.bf16.mxu1 %v2805_v23  ;;  %v2256_v23 = vld [vmem:[%s4049_s13 + $0x48] sm:$0xff] }
0x240e   :  { %v2842_v25 = vpack.c.bf16 %v2256_v23, %v2255_v15 }
0x2410   :  { %2808 = vmatpush3.bf16.msra.mxu1 %v2807_v40  ;;  %v2121_v40 = vld [vmem:[%s4046_s10] sm:$0x3] }
0x2411   :  { %2810 = vmatprep.subr.bf16.mxu1 %v2809_v45  ;;  %v2126_v45 = vrot.slane %v2121_v40, %v144_v4  ;;  %v2130_v22 = vrot.slane %v2121_v40, %v148_v6  ;;  %v2262_v6 = vld [vmem:[%s4049_s13 + $0x78] sm:$0xff] }
0x2414   :  { %2812 = vmatpush3.bf16.msra.mxu1 %v2811_v7 }
0x2415   :  { %2814 = vmatprep.subr.bf16.mxu1 %v2813_v8  ;;  %v2259_v8 = vld [vmem:[%s4049_s13 + $0x60] sm:$0xff] }
0x245e   :  { %v1765_v17 = vpop.permute.xlu1 %1764 }
0x245f   :  { %v1767_v56 = vmul.f32 %v3802_v61, %v1765_v17  ;;  %v2163_v17 = vld [vmem:[%s4047_s11 + $0xd0] sm:$0xff] }
0x2461   :  { %1769 = vrot.lane.b32.xlu1 %v1767_v56, %s3141_s19  ;;  %v1953_v56 = vld [vmem:[%s4045_s9] sm:$0xff] }
0x2468   :  { %v1944_v26 = vpop.permute.xlu0 %1943 }
0x2469   :  { %v1946_v27 = vmul.f32 %v3053_v24, %v1944_v26  ;;  %v1958_v26 = vld [vmem:[%s4045_s9 + $0x28] sm:$0xff] }
0x246b   :  { %3054 = vtanh.f32 %v1946_v27  ;;  %v1960_v27 = vld [vmem:[%s4045_s9 + $0x38] sm:$0xff] }
0x246c   :  { %v2793_v42 = vpack.c.bf16 %v1960_v27, %v1958_v26 }
0x2475   :  { %v3055_v28 = vpop.eup %3054 }
0x2476   :  { %1949 = vrot.lane.b32.xlu0 %v3055_v28, %s3144_s7  ;;  %v2815_v28 = vpack.c.bf16 %v2146_v46, %v2145_v60  ;;  %v2260_v60 = vld [vmem:[%s4049_s13 + $0x68] sm:$0xff]  ;;  %v2851_v46 = vpack.c.bf16 %v2262_v6, %v2261_v62 }
0x2477   :  { %v2848_v4 = vpack.c.bf16 %v2260_v60, %v2259_v8 }
0x2478   :  { %2816 = vmatpush3.bf16.msra.mxu1 %v2815_v28 }
0x24d3   :  { %v1770_v31 = vpop.permute.xlu1 %1769 }
0x24d4   :  { %v1772_v39 = vadd.f32 %v1770_v31, %v1762_v30  ;;  %v2147_v31 = vld [vmem:[%s4047_s11 + $0x50] sm:$0xff] }
0x24d5   :  { %v2819_v33 = vpack.c.bf16 %v2148_v36, %v2147_v31  ;;  %v2447_v36 = vld [vmem:[%s4051_s15] ss:$0 sm:$0xff] }
0x24d6   :  { %3056 = vtanh.f32 %v1772_v39  ;;  %v2165_v39 = vld [vmem:[%s4047_s11 + $0xe0] sm:$0xff] }
0x24d7   :  { %v2821_v34 = vpack.c.bf16 %v2166_v41, %v2165_v39 }
0x24e0   :  { %v3057_v51 = vpop.eup %3056 }
0x24e1   :  { %1775 = vrot.lane.b32.xlu1 %v3057_v51, %s3137_s3  ;;  %v2168_v51 = vld [vmem:[%s4047_s11 + $0xf8] sm:$0xff] }
0x24e8   :  { %v1950_v52 = vpop.permute.xlu0 %1949 }
0x24e9   :  { %v1952_v20 = vmul.f32 %v3053_v24, %v1950_v52  ;;  %v1955_v24 = vld [vmem:[%s4045_s9 + $0x10] sm:$0xff]  ;;  %v2825_v52 = vpack.c.bf16 %v2168_v51, %v2167_v49 }
0x24ea   :  { %v2791_v38 = vpack.c.bf16 %v1955_v24, %v1953_v56 }
0x24eb   :  { %1970 = vrot.lane.b32.xlu0 %v1952_v20, %s3141_s19  ;;  %v2152_v20 = vld [vmem:[%s4047_s11 + $0x78] sm:$0xff] }
0x2553   :  { %v1776_v44 = vpop.permute.xlu1 %1775 }
0x2554   :  { %v1778_v16 = vmul.f32 %v3802_v61, %v1776_v44  ;;  %v2164_v61 = vld [vmem:[%s4047_s11 + $0xd8] sm:$0xff] }
0x2555   :  { %v2817_v30 = vpack.c.bf16 %v2164_v61, %v2163_v17  ;;  %v2445_v61 = vld [vmem:[%s4048_s12] ss:$0 sm:$0xff] }
0x2556   :  { %2046 = vrot.lane.b32.xlu1 %v1778_v16, %s3141_s19 }
0x2557   :  { %2818 = vmatprep.subr.bf16.mxu1 %v2817_v30 }
0x2558   :  { %2820 = vmatpush3.bf16.msra.mxu1 %v2819_v33 }
0x2559   :  { %2822 = vmatprep.subr.bf16.mxu1 %v2821_v34 }
0x255c   :  { %2824 = vmatpush3.bf16.msra.mxu1 %v2823_v13 }
0x255d   :  { %v1971_v1 = vpop.permute.xlu0 %1970  ;;  %2826 = vmatprep.subr.bf16.mxu1 %v2825_v52 }
0x255e   :  { %2443 = vmatmul.mubr.msk.f32.vlgmr.msra.gmra.mrb[46].mxu0 %vm918_vm2, %v1971_v1 }
0x255f   :  { %2792 = vmatpush1.bf16.msra.mxu0 %v2791_v38  ;;  %2114 = vmatprep.mubr.f32.mxu0 %v3140_v2 }
0x2560   :  { %2794 = vmatprep.subr.bf16.mxu0 %v2793_v42  ;;  %v2448_v42 = vld [vmem:[#allocation2] ss:$0 sm:$0xff] }
0x2563   :  { %2796 = vmatpush1.bf16.msra.mxu0 %v2795_v35 }
0x2564   :  { %2829 = vmatprep.subr.bf16.mxu0 %v3143_v57 }
0x25c8   :  { %v2047_v47 = vpop.permute.xlu1 %2046 }
0x25c9   :  { %2444 = vmatmul.mubr.msk.f32.vlgmr.msra.gmra.mrb[46].mxu0 %vm918_vm2, %v2047_v47 }
0x25ca   :  { %2718 = vmatprep.mubr.msk.f32.mxu0 %vm3142_vm1, %v3140_v2  ;;  %v2151_v2 = vld [vmem:[%s4047_s11 + $0x70] sm:$0xff]  ;;  %2831 = vmatpush3.bf16.msra.mxu0 %v2830_v59 }
0x25cb   :  { %v2827_v53 = vpack.c.bf16 %v2152_v20, %v2151_v2  ;;  %2832 = vmatprep.subr.bf16.mxu0 %v3143_v57 }
0x25cd   :  { %2828 = vmatpush3.bf16.msra.mxu1 %v2827_v53 }
0x25ce   :  { %2834 = vmatpush3.bf16.msra.mxu0 %v2833_v0 }
0x25cf   :  { %2835 = vmatprep.subr.bf16.mxu0 %v3143_v57 }
0x25d2   :  { %2837 = vmatpush3.bf16.msra.mxu0 %v2836_v11 }
0x25d3   :  { %2838 = vmatprep.subr.bf16.mxu0 %v3143_v57 }
0x25d6   :  { %2840 = vmatpush3.bf16.msra.mxu0 %v2839_v14 }
0x25d7   :  { %2841 = vmatprep.subr.bf16.mxu0 %v3143_v57 }
0x25da   :  { %2843 = vmatpush3.bf16.msra.mxu0 %v2842_v25 }
0x25db   :  { %2844 = vmatprep.subr.bf16.mxu0 %v3143_v57 }
0x25de   :  { %2846 = vmatpush3.bf16.msra.mxu0 %v2845_v37 }
0x25df   :  { %2847 = vmatprep.subr.bf16.mxu0 %v3143_v57 }
0x25e2   :  { %2849 = vmatpush3.bf16.msra.mxu0 %v2848_v4 }
0x25e3   :  { %2850 = vmatprep.subr.bf16.mxu0 %v3143_v57  ;;  %v2446_v57 = vld [vmem:[%s4050_s14] ss:$0 sm:$0xff] }
0x25e6   :  { %2852 = vmatpush3.bf16.msra.mxu0 %v2851_v46 }
0x269c   :  { %v2116_v21 = vpop.f32.mrb[46].mxu0 }
0x269d   :  { %v2133_v44 = vadd.f32 %v2126_v45, %v2116_v21  ;;  %v2118_v3 = vpop.f32.mrb[47].mxu0 }
0x269e   :  { %v2134_v19 = vadd.f32 %v2130_v22, %v2118_v3 }
0x269f   :  { %v2135_v7 = vmax.f32 %v2133_v44, 0.0 }
0x26a0   :  { %v2136_v16 = vmax.f32 %v2134_v19, 0.0 }
0x26a2   :  { %2240 = vmatprep.mubr.f32.mxu1 %v2136_v16 }
0x26a3   :  { %2241 = vmatmul.mubr.f32.vlgmr.msra.gmra.mrb[46].mxu1 %v2135_v7 }
0x2776   :  { %v2540_v17 = vpop.f32.mrb[46].mxu1 }
0x2777   :  { %v2541_v56 = vpop.f32.mrb[47].mxu1 }
0x2778   :  { %v2542_v24 = vadd.f32 %v2541_v56, %v2540_v17 }
0x277a   :  { %v2243_v26 = vadd.f32 %v2542_v24, %v2445_v61 }
0x277c   :  { %v2246_v27 = vmax.f32 %v2243_v26, 0.0 }
0x277e   :  { %2719 = vmatmul.mubr.f32.vlgmr.msra.gmra.mrb[48].mxu0 %v2246_v27 }
0x2851   :  { %v2336_v28 = vpop.f32.mrb[48].mxu0 }
0x2852   :  { %v2337_v30 = vadd.f32 %v2446_v57, %v2336_v28  ;;  %v2720_v31 = vpop.f32.mrb[49].mxu0 }
0x2854   :  { %v2340_v38 = vmax.f32 %v2337_v30, 0.0 }
0x2856   :  { %v2348_v39 = vmul.f32 %v2447_v36, %v2340_v38 }
0x2858   :  { %v2349_v41 = vsel %vm313_vm0, %v2348_v39, 0.0 }
0x2859   :  { %2350 = vadd.xlane.f32.xlu0 %v2349_v41 }
0x28e6   :  { %v2351_v43 = vpop.xlane.xlu0 %2350 }
0x28e7   :  { %v2359_v9 = vadd.f32 %v2448_v42, %v2351_v43 }
0x28e9   :  { %v2449_v1 = vmul.f32 -1.442695, %v2359_v9 }
0x28eb   :  { %3058 = vpow2.f32 %v2449_v1 }
0x28f5   :  { %v3059_v33 = vpop.eup %3058 }
0x28f6   :  { %v2363_v34 = vadd.f32 1.0, %v3059_v33 }
0x28f8   :  { %3060 = vrcp.f32 %v2363_v34 }
0x2902   :  { %v3061_v35 = vpop.eup %3060 }
0x2903   :  { %2367 = vst.msk [vmem:[%s4053_s17] sm:$0xff] %vm2366_vm3, %v3061_v35 }
0x2904   :  { %2372 = vsyncpa [#allocation4], 1 }
0x2905   :  { %2373 = vsyncpa [#allocation6], 1 }

</bundles_post_ra>
